<compile_context>
chip_gen: v5e
topology: v5e:2x2
jax: 0.10.0
libtpu: 0.0.40
codegen_flags: <defaults>
</compile_context>

<pallas_src>
import functools

import jax
import jax.numpy as jnp
import numpy as np
from jax.experimental import pallas as pl
from jax.experimental.pallas import tpu as pltpu


# ---------------------------------------------------------------------------
# Fused per-layer kernel:
#   y = x @ W_eff                                    (LoRA already folded)
#   for each head h (static unroll):
#     a_i[n] = <y[n, hC:(h+1)C], eff_att_src[h]>     (destination score)
#     a_j[n] = <y[n, hC:(h+1)C], eff_att_dst[h]>     (source score)
#     S[i,j] = leaky_relu(a_i[i] + a_j[j]);  masked softmax over j;  O_h = P @ Y_h
#   output = concat_h(O_h)  or  mean_h(O_h)
# ---------------------------------------------------------------------------
def _lora_gat_layer_kernel(x_ref, w_ref, adj_ref, asrc_ref, adst_ref, o_ref,
                           *, heads, c, concat, negative_slope):
    x = x_ref[...]                                                     # [N, Din]
    y = jnp.dot(x, w_ref[...], preferred_element_type=jnp.float32)     # [N, H*C]

    # int8 adjacency -> f32 once (cheap; keeps mask in the same layout as the
    # f32 score matrix), reused by every head.  adj[i, j] = 1 iff edge j -> i.
    mask = adj_ref[...].astype(jnp.float32) > 0.0                      # [N, N]

    att_src = asrc_ref[...]                                            # [H, C]
    att_dst = adst_ref[...]                                            # [H, C]

    head_outs = []
    for h in range(heads):                      # static unroll (heads is small)
        xh = y[:, h * c:(h + 1) * c]                                   # [N, C]
        a_i = jnp.sum(xh * att_src[h:h + 1, :], axis=-1, keepdims=True)  # [N, 1]
        a_j = jnp.sum(xh * att_dst[h:h + 1, :], axis=-1, keepdims=True)  # [N, 1]

        s = a_i + a_j.reshape(1, -1)                                   # [N, N]
        s = jnp.where(s > 0, s, negative_slope * s)                    # leaky relu
        s = jnp.where(mask, s, -1e30)                                  # mask non-edges (f32)
        s = s - jnp.max(s, axis=-1, keepdims=True)                     # segment-softmax shift
        e = jnp.where(mask, jnp.exp(s), 0.0)
        denom = jnp.sum(e, axis=-1, keepdims=True)                     # > 0 (self loops)
        p = e * pl.reciprocal(denom, approx=True)                      # EUP reciprocal
        head_outs.append(jnp.dot(p, xh, preferred_element_type=jnp.float32))

    if concat:
        out = jnp.concatenate(head_outs, axis=-1)                      # [N, H*C] lane-dense
    else:
        out = head_outs[0]
        for t in head_outs[1:]:
            out = out + t
        out = out * (1.0 / heads)                                      # head mean  [N, C]
    o_ref[...] = out.astype(o_ref.dtype)


def lora_gat_layer(x, adj_i8, w_eff, att_src_eff, att_dst_eff,
                   heads, c, concat, negative_slope=0.2):
    n, din = x.shape
    dout = heads * c if concat else c
    kernel = functools.partial(_lora_gat_layer_kernel,
                               heads=heads, c=c, concat=concat,
                               negative_slope=float(negative_slope))
    return pl.pallas_call(
        kernel,
        out_shape=jax.ShapeDtypeStruct((n, dout), jnp.float32),
        grid=(1,),
        in_specs=[
            pl.BlockSpec((n, din), lambda i: (0, 0)),
            pl.BlockSpec(w_eff.shape, lambda i: (0, 0)),
            pl.BlockSpec((n, n), lambda i: (0, 0)),
            pl.BlockSpec((heads, c), lambda i: (0, 0)),
            pl.BlockSpec((heads, c), lambda i: (0, 0)),
        ],
        out_specs=pl.BlockSpec((n, dout), lambda i: (0, 0)),
    )(x, w_eff, adj_i8, att_src_eff, att_dst_eff)


# ---------------------------------------------------------------------------
# Parameter setup + one-time LoRA folding (done outside the kernels).
# ---------------------------------------------------------------------------
def make_layer_params(key, din, c, heads, rank, alpha):
    dout = heads * c
    r2 = max(rank // 2, 1)
    ks = jax.random.split(key, 8)
    s = 0.1
    params = dict(
        w_t=jax.random.normal(ks[0], (din, dout), jnp.float32) * s,
        lin_a_t=jax.random.normal(ks[1], (din, rank), jnp.float32) * s,
        lin_b_t=jax.random.normal(ks[2], (rank, dout), jnp.float32) * s,
        att_src=jax.random.normal(ks[3], (heads, c), jnp.float32) * s,
        att_dst=jax.random.normal(ks[4], (heads, c), jnp.float32) * s,
        att_src_a=jax.random.normal(ks[5], (c, r2), jnp.float32) * s,
        att_src_b=jax.random.normal(ks[6], (1, r2), jnp.float32) * s,
        att_dst_a=jax.random.normal(ks[7], (c, r2), jnp.float32) * s,
        att_dst_b=jax.random.normal(jax.random.fold_in(key, 99), (1, r2), jnp.float32) * s,
    )
    cfg = dict(heads=heads, c=c,
               lin_scaling=alpha / rank,
               att_scaling=alpha / r2)
    return params, cfg


def fold_layer_params(params, cfg):
    """One-time exact folds: W_eff = W + s*(A@B);  eff_att = att + s*(A@b)."""
    w_eff = params["w_t"] + cfg["lin_scaling"] * (params["lin_a_t"] @ params["lin_b_t"])
    asrc = params["att_src"] + cfg["att_scaling"] * (
        params["att_src_a"] @ params["att_src_b"][0])[None, :]
    adst = params["att_dst"] + cfg["att_scaling"] * (
        params["att_dst_a"] @ params["att_dst_b"][0])[None, :]
    return dict(w_eff=w_eff, att_src=asrc, att_dst=adst,
                heads=cfg["heads"], c=cfg["c"])


def lora_gat_forward(x, adj_i8, folded_layers):
    for i, (fp, concat) in enumerate(folded_layers):
        x = lora_gat_layer(x, adj_i8, fp["w_eff"], fp["att_src"], fp["att_dst"],
                           fp["heads"], fp["c"], concat)
        if i < len(folded_layers) - 1:
            x = jax.nn.elu(x)            # dropout = identity (eval mode)
    return x


# ---------------------------------------------------------------------------
# Pure-JAX reference (unfolded math, exact division) for verification.
# ---------------------------------------------------------------------------
def ref_forward(x, adj, layers, negative_slope=0.2):
    for i, (p, cfg, concat) in enumerate(layers):
        heads, c = cfg["heads"], cfg["c"]
        n = x.shape[0]
        y = x @ p["w_t"] + (x @ p["lin_a_t"]) @ p["lin_b_t"] * cfg["lin_scaling"]
        xh = y.reshape(n, heads, c)                                   # [N, H, C]

        def score(w_base, a_t, b_row):
            base = jnp.einsum("nhc,hc->nh", xh, w_base)
            lora = jnp.einsum("nhr,r->nh", jnp.einsum("nhc,cr->nhr", xh, a_t), b_row[0])
            return base + lora * cfg["att_scaling"]

        a_i = score(p["att_src"], p["att_src_a"], p["att_src_b"])     # dst score [N, H]
        a_j = score(p["att_dst"], p["att_dst_a"], p["att_dst_b"])     # src score [N, H]
        s = a_i[:, None, :] + a_j[None, :, :]                         # [N, N, H]
        s = jnp.where(s > 0, s, negative_slope * s)
        mask = (adj > 0)[:, :, None]
        s = jnp.where(mask, s, -1e30)
        s = s - jnp.max(s, axis=1, keepdims=True)
        e = jnp.where(mask, jnp.exp(s), 0.0)
        prob = e / jnp.sum(e, axis=1, keepdims=True)
        out = jnp.einsum("ijh,jhc->ihc", prob, xh)
        x = out.reshape(n, heads * c) if concat else out.mean(axis=1)
        if i < len(layers) - 1:
            x = jax.nn.elu(x)
    return x


if __name__ == "__main__":
    key = jax.random.PRNGKey(0)

    # Model config (mirrors LoRAGAT(input_dim=16, hidden_dims=[32], output_dim=8,
    #                              heads=4, rank=8, alpha=32, num_layers=2,
    #                              concat_heads=True)):
    input_dim, hidden_dim, output_dim = 16, 32, 8
    heads, rank, alpha = 4, 8, 32.0
    # effective dims: layer0: 16 -> 4 heads x 8 (concat), layer1: 32 -> 8 (head mean)
    k0, k1, kx = jax.random.split(key, 3)
    params0, cfg0 = make_layer_params(k0, input_dim, hidden_dim // heads, heads, rank, alpha)
    params1, cfg1 = make_layer_params(k1, hidden_dim, output_dim, heads, rank, alpha)
    layers = [(params0, cfg0, True), (params1, cfg1, False)]

    # One-time LoRA folding (outside the kernels / jit).
    folded_layers = [(fold_layer_params(p, cfg), concat) for p, cfg, concat in layers]

    # Graph: N nodes, bidirectional ring edges; self loops added (as in forward).
    num_nodes = 12
    x = jax.random.normal(kx, (num_nodes, input_dim), jnp.float32)
    src = np.arange(num_nodes)
    dst = (np.arange(num_nodes) + 1) % num_nodes
    edge_index = np.stack([np.concatenate([src, dst]),
                           np.concatenate([dst, src])], axis=0)        # [2, 2N]
    adj = np.zeros((num_nodes, num_nodes), np.int8)
    adj[edge_index[1], edge_index[0]] = 1          # adj[i, j] = 1 iff edge j -> i
    adj = np.maximum(adj, np.eye(num_nodes, dtype=np.int8))  # add_self_loops
    adj = jnp.asarray(adj)                                   # int8 mask

    fwd = jax.jit(lambda xx, aa: lora_gat_forward(xx, aa, folded_layers))
    out = jax.block_until_ready(fwd(x, adj))

    ref = ref_forward(x, adj, layers)
    assert out.shape == (num_nodes, output_dim), out.shape
    np.testing.assert_allclose(np.asarray(out), np.asarray(ref), rtol=2e-3, atol=2e-3)

    print("KERNEL_OK")
</pallas_src>

<mosaic_0001>
module attributes {stable_mosaic.version = 11 : i64} {
  func.func @_lora_gat_layer_kernel(%arg0: i32, %arg1: memref<12x16xf32, #tpu.memory_space<vmem>>, %arg2: memref<16x32xf32, #tpu.memory_space<vmem>>, %arg3: memref<12x12xi8, #tpu.memory_space<vmem>>, %arg4: memref<4x8xf32, #tpu.memory_space<vmem>>, %arg5: memref<4x8xf32, #tpu.memory_space<vmem>>, %arg6: memref<12x32xf32, #tpu.memory_space<vmem>>) attributes {dimension_semantics = [#tpu.dimension_semantics<arbitrary>], iteration_bounds = array<i64: 1>, scalar_prefetch = 0 : i64, scratch_operands = 0 : i64, tpu.core_type = #tpu.core_type<tc>, window_params = [{pipeline_mode = #tpu.pipeline_mode<synchronous>, transform_indices = @transform_0, window_bounds = array<i64: 12, 16>}, {pipeline_mode = #tpu.pipeline_mode<synchronous>, transform_indices = @transform_1, window_bounds = array<i64: 16, 32>}, {pipeline_mode = #tpu.pipeline_mode<synchronous>, transform_indices = @transform_2, window_bounds = array<i64: 12, 12>}, {pipeline_mode = #tpu.pipeline_mode<synchronous>, transform_indices = @transform_3, window_bounds = array<i64: 4, 8>}, {pipeline_mode = #tpu.pipeline_mode<synchronous>, transform_indices = @transform_4, window_bounds = array<i64: 4, 8>}, {pipeline_mode = #tpu.pipeline_mode<synchronous>, transform_indices = @transform_5, window_bounds = array<i64: 12, 32>}]} {
    %c0 = arith.constant 0 : index
    %c0_0 = arith.constant 0 : index
    %0 = vector.load %arg1[%c0, %c0_0] : memref<12x16xf32, #tpu.memory_space<vmem>>, vector<12x16xf32>
    %c0_1 = arith.constant 0 : index
    %c0_2 = arith.constant 0 : index
    %1 = vector.load %arg2[%c0_1, %c0_2] : memref<16x32xf32, #tpu.memory_space<vmem>>, vector<16x32xf32>
    %cst = arith.constant dense<0.000000e+00> : vector<12x32xf32>
    %2 = tpu.matmul %0, %1, %cst {dimension_numbers = #tpu.dot_dimension_numbers<[1], [0], [0], [1], [0, 0, 1, 1], [], []>} : vector<12x16xf32>, vector<16x32xf32>, vector<12x32xf32> -> vector<12x32xf32>
    %c0_3 = arith.constant 0 : index
    %c0_4 = arith.constant 0 : index
    %3 = vector.load %arg3[%c0_3, %c0_4] : memref<12x12xi8, #tpu.memory_space<vmem>>, vector<12x12xi8>
    %4 = arith.sitofp %3 : vector<12x12xi8> to vector<12x12xf32>
    %cst_5 = arith.constant 0.000000e+00 : f32
    %5 = vector.broadcast %cst_5 : f32 to vector<12x12xf32>
    %6 = arith.cmpf ogt, %4, %5 : vector<12x12xf32>
    %c0_6 = arith.constant 0 : index
    %c0_7 = arith.constant 0 : index
    %7 = vector.load %arg4[%c0_6, %c0_7] : memref<4x8xf32, #tpu.memory_space<vmem>>, vector<4x8xf32>
    %c0_8 = arith.constant 0 : index
    %c0_9 = arith.constant 0 : index
    %8 = vector.load %arg5[%c0_8, %c0_9] : memref<4x8xf32, #tpu.memory_space<vmem>>, vector<4x8xf32>
    %9 = vector.extract_strided_slice %2 {offsets = [0, 0], sizes = [12, 8], strides = [1, 1]} : vector<12x32xf32> to vector<12x8xf32>
    %10 = vector.extract_strided_slice %7 {offsets = [0, 0], sizes = [1, 8], strides = [1, 1]} : vector<4x8xf32> to vector<1x8xf32>
    %11 = vector.broadcast %10 : vector<1x8xf32> to vector<12x8xf32>
    %12 = arith.mulf %9, %11 : vector<12x8xf32>
    %cst_10 = arith.constant dense<0.000000e+00> : vector<12xf32>
    %13 = vector.multi_reduction <add>, %12, %cst_10 [1] : vector<12x8xf32> to vector<12xf32>
    %14 = vector.shape_cast %13 : vector<12xf32> to vector<12x1xf32>
    %15 = vector.extract_strided_slice %8 {offsets = [0, 0], sizes = [1, 8], strides = [1, 1]} : vector<4x8xf32> to vector<1x8xf32>
    %16 = vector.broadcast %15 : vector<1x8xf32> to vector<12x8xf32>
    %17 = arith.mulf %9, %16 : vector<12x8xf32>
    %cst_11 = arith.constant dense<0.000000e+00> : vector<12xf32>
    %18 = vector.multi_reduction <add>, %17, %cst_11 [1] : vector<12x8xf32> to vector<12xf32>
    %19 = vector.shape_cast %18 : vector<12xf32> to vector<12x1xf32>
    %20 = vector.shape_cast %19 : vector<12x1xf32> to vector<1x12xf32>
    %21 = vector.broadcast %14 : vector<12x1xf32> to vector<12x12xf32>
    %22 = vector.broadcast %20 : vector<1x12xf32> to vector<12x12xf32>
    %23 = arith.addf %21, %22 : vector<12x12xf32>
    %cst_12 = arith.constant 0.000000e+00 : f32
    %24 = vector.broadcast %cst_12 : f32 to vector<12x12xf32>
    %25 = arith.cmpf ogt, %23, %24 : vector<12x12xf32>
    %cst_13 = arith.constant 2.000000e-01 : f32
    %26 = vector.broadcast %cst_13 : f32 to vector<12x12xf32>
    %27 = arith.mulf %26, %23 : vector<12x12xf32>
    %28 = arith.select %25, %23, %27 : vector<12x12xi1>, vector<12x12xf32>
    %cst_14 = arith.constant -1.000000e+30 : f32
    %29 = vector.broadcast %cst_14 : f32 to vector<12x12xf32>
    %30 = arith.select %6, %28, %29 : vector<12x12xi1>, vector<12x12xf32>
    %cst_15 = arith.constant dense<0xFF800000> : vector<12xf32>
    %31 = vector.multi_reduction <maximumf>, %30, %cst_15 [1] : vector<12x12xf32> to vector<12xf32>
    %32 = vector.shape_cast %31 : vector<12xf32> to vector<12x1xf32>
    %33 = vector.broadcast %32 : vector<12x1xf32> to vector<12x12xf32>
    %34 = arith.subf %30, %33 : vector<12x12xf32>
    %35 = math.exp %34 : vector<12x12xf32>
    %cst_16 = arith.constant 0.000000e+00 : f32
    %36 = vector.broadcast %cst_16 : f32 to vector<12x12xf32>
    %37 = arith.select %6, %35, %36 : vector<12x12xi1>, vector<12x12xf32>
    %cst_17 = arith.constant dense<0.000000e+00> : vector<12xf32>
    %38 = vector.multi_reduction <add>, %37, %cst_17 [1] : vector<12x12xf32> to vector<12xf32>
    %39 = vector.shape_cast %38 : vector<12xf32> to vector<12x1xf32>
    %40 = tpu.reciprocal %39 {approx = true} : vector<12x1xf32> -> vector<12x1xf32>
    %41 = vector.broadcast %40 : vector<12x1xf32> to vector<12x12xf32>
    %42 = arith.mulf %37, %41 : vector<12x12xf32>
    %cst_18 = arith.constant dense<0.000000e+00> : vector<12x8xf32>
    %43 = tpu.matmul %42, %9, %cst_18 {dimension_numbers = #tpu.dot_dimension_numbers<[1], [0], [0], [1], [0, 0, 1, 1], [], []>} : vector<12x12xf32>, vector<12x8xf32>, vector<12x8xf32> -> vector<12x8xf32>
    %44 = vector.extract_strided_slice %2 {offsets = [0, 8], sizes = [12, 8], strides = [1, 1]} : vector<12x32xf32> to vector<12x8xf32>
    %45 = vector.extract_strided_slice %7 {offsets = [1, 0], sizes = [1, 8], strides = [1, 1]} : vector<4x8xf32> to vector<1x8xf32>
    %46 = vector.broadcast %45 : vector<1x8xf32> to vector<12x8xf32>
    %47 = arith.mulf %44, %46 : vector<12x8xf32>
    %cst_19 = arith.constant dense<0.000000e+00> : vector<12xf32>
    %48 = vector.multi_reduction <add>, %47, %cst_19 [1] : vector<12x8xf32> to vector<12xf32>
    %49 = vector.shape_cast %48 : vector<12xf32> to vector<12x1xf32>
    %50 = vector.extract_strided_slice %8 {offsets = [1, 0], sizes = [1, 8], strides = [1, 1]} : vector<4x8xf32> to vector<1x8xf32>
    %51 = vector.broadcast %50 : vector<1x8xf32> to vector<12x8xf32>
    %52 = arith.mulf %44, %51 : vector<12x8xf32>
    %cst_20 = arith.constant dense<0.000000e+00> : vector<12xf32>
    %53 = vector.multi_reduction <add>, %52, %cst_20 [1] : vector<12x8xf32> to vector<12xf32>
    %54 = vector.shape_cast %53 : vector<12xf32> to vector<12x1xf32>
    %55 = vector.shape_cast %54 : vector<12x1xf32> to vector<1x12xf32>
    %56 = vector.broadcast %49 : vector<12x1xf32> to vector<12x12xf32>
    %57 = vector.broadcast %55 : vector<1x12xf32> to vector<12x12xf32>
    %58 = arith.addf %56, %57 : vector<12x12xf32>
    %cst_21 = arith.constant 0.000000e+00 : f32
    %59 = vector.broadcast %cst_21 : f32 to vector<12x12xf32>
    %60 = arith.cmpf ogt, %58, %59 : vector<12x12xf32>
    %cst_22 = arith.constant 2.000000e-01 : f32
    %61 = vector.broadcast %cst_22 : f32 to vector<12x12xf32>
    %62 = arith.mulf %61, %58 : vector<12x12xf32>
    %63 = arith.select %60, %58, %62 : vector<12x12xi1>, vector<12x12xf32>
    %cst_23 = arith.constant -1.000000e+30 : f32
    %64 = vector.broadcast %cst_23 : f32 to vector<12x12xf32>
    %65 = arith.select %6, %63, %64 : vector<12x12xi1>, vector<12x12xf32>
    %cst_24 = arith.constant dense<0xFF800000> : vector<12xf32>
    %66 = vector.multi_reduction <maximumf>, %65, %cst_24 [1] : vector<12x12xf32> to vector<12xf32>
    %67 = vector.shape_cast %66 : vector<12xf32> to vector<12x1xf32>
    %68 = vector.broadcast %67 : vector<12x1xf32> to vector<12x12xf32>
    %69 = arith.subf %65, %68 : vector<12x12xf32>
    %70 = math.exp %69 : vector<12x12xf32>
    %cst_25 = arith.constant 0.000000e+00 : f32
    %71 = vector.broadcast %cst_25 : f32 to vector<12x12xf32>
    %72 = arith.select %6, %70, %71 : vector<12x12xi1>, vector<12x12xf32>
    %cst_26 = arith.constant dense<0.000000e+00> : vector<12xf32>
    %73 = vector.multi_reduction <add>, %72, %cst_26 [1] : vector<12x12xf32> to vector<12xf32>
    %74 = vector.shape_cast %73 : vector<12xf32> to vector<12x1xf32>
    %75 = tpu.reciprocal %74 {approx = true} : vector<12x1xf32> -> vector<12x1xf32>
    %76 = vector.broadcast %75 : vector<12x1xf32> to vector<12x12xf32>
    %77 = arith.mulf %72, %76 : vector<12x12xf32>
    %cst_27 = arith.constant dense<0.000000e+00> : vector<12x8xf32>
    %78 = tpu.matmul %77, %44, %cst_27 {dimension_numbers = #tpu.dot_dimension_numbers<[1], [0], [0], [1], [0, 0, 1, 1], [], []>} : vector<12x12xf32>, vector<12x8xf32>, vector<12x8xf32> -> vector<12x8xf32>
    %79 = vector.extract_strided_slice %2 {offsets = [0, 16], sizes = [12, 8], strides = [1, 1]} : vector<12x32xf32> to vector<12x8xf32>
    %80 = vector.extract_strided_slice %7 {offsets = [2, 0], sizes = [1, 8], strides = [1, 1]} : vector<4x8xf32> to vector<1x8xf32>
    %81 = vector.broadcast %80 : vector<1x8xf32> to vector<12x8xf32>
    %82 = arith.mulf %79, %81 : vector<12x8xf32>
    %cst_28 = arith.constant dense<0.000000e+00> : vector<12xf32>
    %83 = vector.multi_reduction <add>, %82, %cst_28 [1] : vector<12x8xf32> to vector<12xf32>
    %84 = vector.shape_cast %83 : vector<12xf32> to vector<12x1xf32>
    %85 = vector.extract_strided_slice %8 {offsets = [2, 0], sizes = [1, 8], strides = [1, 1]} : vector<4x8xf32> to vector<1x8xf32>
    %86 = vector.broadcast %85 : vector<1x8xf32> to vector<12x8xf32>
    %87 = arith.mulf %79, %86 : vector<12x8xf32>
    %cst_29 = arith.constant dense<0.000000e+00> : vector<12xf32>
    %88 = vector.multi_reduction <add>, %87, %cst_29 [1] : vector<12x8xf32> to vector<12xf32>
    %89 = vector.shape_cast %88 : vector<12xf32> to vector<12x1xf32>
    %90 = vector.shape_cast %89 : vector<12x1xf32> to vector<1x12xf32>
    %91 = vector.broadcast %84 : vector<12x1xf32> to vector<12x12xf32>
    %92 = vector.broadcast %90 : vector<1x12xf32> to vector<12x12xf32>
    %93 = arith.addf %91, %92 : vector<12x12xf32>
    %cst_30 = arith.constant 0.000000e+00 : f32
    %94 = vector.broadcast %cst_30 : f32 to vector<12x12xf32>
    %95 = arith.cmpf ogt, %93, %94 : vector<12x12xf32>
    %cst_31 = arith.constant 2.000000e-01 : f32
    %96 = vector.broadcast %cst_31 : f32 to vector<12x12xf32>
    %97 = arith.mulf %96, %93 : vector<12x12xf32>
    %98 = arith.select %95, %93, %97 : vector<12x12xi1>, vector<12x12xf32>
    %cst_32 = arith.constant -1.000000e+30 : f32
    %99 = vector.broadcast %cst_32 : f32 to vector<12x12xf32>
    %100 = arith.select %6, %98, %99 : vector<12x12xi1>, vector<12x12xf32>
    %cst_33 = arith.constant dense<0xFF800000> : vector<12xf32>
    %101 = vector.multi_reduction <maximumf>, %100, %cst_33 [1] : vector<12x12xf32> to vector<12xf32>
    %102 = vector.shape_cast %101 : vector<12xf32> to vector<12x1xf32>
    %103 = vector.broadcast %102 : vector<12x1xf32> to vector<12x12xf32>
    %104 = arith.subf %100, %103 : vector<12x12xf32>
    %105 = math.exp %104 : vector<12x12xf32>
    %cst_34 = arith.constant 0.000000e+00 : f32
    %106 = vector.broadcast %cst_34 : f32 to vector<12x12xf32>
    %107 = arith.select %6, %105, %106 : vector<12x12xi1>, vector<12x12xf32>
    %cst_35 = arith.constant dense<0.000000e+00> : vector<12xf32>
    %108 = vector.multi_reduction <add>, %107, %cst_35 [1] : vector<12x12xf32> to vector<12xf32>
    %109 = vector.shape_cast %108 : vector<12xf32> to vector<12x1xf32>
    %110 = tpu.reciprocal %109 {approx = true} : vector<12x1xf32> -> vector<12x1xf32>
    %111 = vector.broadcast %110 : vector<12x1xf32> to vector<12x12xf32>
    %112 = arith.mulf %107, %111 : vector<12x12xf32>
    %cst_36 = arith.constant dense<0.000000e+00> : vector<12x8xf32>
    %113 = tpu.matmul %112, %79, %cst_36 {dimension_numbers = #tpu.dot_dimension_numbers<[1], [0], [0], [1], [0, 0, 1, 1], [], []>} : vector<12x12xf32>, vector<12x8xf32>, vector<12x8xf32> -> vector<12x8xf32>
    %114 = vector.extract_strided_slice %2 {offsets = [0, 24], sizes = [12, 8], strides = [1, 1]} : vector<12x32xf32> to vector<12x8xf32>
    %115 = vector.extract_strided_slice %7 {offsets = [3, 0], sizes = [1, 8], strides = [1, 1]} : vector<4x8xf32> to vector<1x8xf32>
    %116 = vector.broadcast %115 : vector<1x8xf32> to vector<12x8xf32>
    %117 = arith.mulf %114, %116 : vector<12x8xf32>
    %cst_37 = arith.constant dense<0.000000e+00> : vector<12xf32>
    %118 = vector.multi_reduction <add>, %117, %cst_37 [1] : vector<12x8xf32> to vector<12xf32>
    %119 = vector.shape_cast %118 : vector<12xf32> to vector<12x1xf32>
    %120 = vector.extract_strided_slice %8 {offsets = [3, 0], sizes = [1, 8], strides = [1, 1]} : vector<4x8xf32> to vector<1x8xf32>
    %121 = vector.broadcast %120 : vector<1x8xf32> to vector<12x8xf32>
    %122 = arith.mulf %114, %121 : vector<12x8xf32>
    %cst_38 = arith.constant dense<0.000000e+00> : vector<12xf32>
    %123 = vector.multi_reduction <add>, %122, %cst_38 [1] : vector<12x8xf32> to vector<12xf32>
    %124 = vector.shape_cast %123 : vector<12xf32> to vector<12x1xf32>
    %125 = vector.shape_cast %124 : vector<12x1xf32> to vector<1x12xf32>
    %126 = vector.broadcast %119 : vector<12x1xf32> to vector<12x12xf32>
    %127 = vector.broadcast %125 : vector<1x12xf32> to vector<12x12xf32>
    %128 = arith.addf %126, %127 : vector<12x12xf32>
    %cst_39 = arith.constant 0.000000e+00 : f32
    %129 = vector.broadcast %cst_39 : f32 to vector<12x12xf32>
    %130 = arith.cmpf ogt, %128, %129 : vector<12x12xf32>
    %cst_40 = arith.constant 2.000000e-01 : f32
    %131 = vector.broadcast %cst_40 : f32 to vector<12x12xf32>
    %132 = arith.mulf %131, %128 : vector<12x12xf32>
    %133 = arith.select %130, %128, %132 : vector<12x12xi1>, vector<12x12xf32>
    %cst_41 = arith.constant -1.000000e+30 : f32
    %134 = vector.broadcast %cst_41 : f32 to vector<12x12xf32>
    %135 = arith.select %6, %133, %134 : vector<12x12xi1>, vector<12x12xf32>
    %cst_42 = arith.constant dense<0xFF800000> : vector<12xf32>
    %136 = vector.multi_reduction <maximumf>, %135, %cst_42 [1] : vector<12x12xf32> to vector<12xf32>
    %137 = vector.shape_cast %136 : vector<12xf32> to vector<12x1xf32>
    %138 = vector.broadcast %137 : vector<12x1xf32> to vector<12x12xf32>
    %139 = arith.subf %135, %138 : vector<12x12xf32>
    %140 = math.exp %139 : vector<12x12xf32>
    %cst_43 = arith.constant 0.000000e+00 : f32
    %141 = vector.broadcast %cst_43 : f32 to vector<12x12xf32>
    %142 = arith.select %6, %140, %141 : vector<12x12xi1>, vector<12x12xf32>
    %cst_44 = arith.constant dense<0.000000e+00> : vector<12xf32>
    %143 = vector.multi_reduction <add>, %142, %cst_44 [1] : vector<12x12xf32> to vector<12xf32>
    %144 = vector.shape_cast %143 : vector<12xf32> to vector<12x1xf32>
    %145 = tpu.reciprocal %144 {approx = true} : vector<12x1xf32> -> vector<12x1xf32>
    %146 = vector.broadcast %145 : vector<12x1xf32> to vector<12x12xf32>
    %147 = arith.mulf %142, %146 : vector<12x12xf32>
    %cst_45 = arith.constant dense<0.000000e+00> : vector<12x8xf32>
    %148 = tpu.matmul %147, %114, %cst_45 {dimension_numbers = #tpu.dot_dimension_numbers<[1], [0], [0], [1], [0, 0, 1, 1], [], []>} : vector<12x12xf32>, vector<12x8xf32>, vector<12x8xf32> -> vector<12x8xf32>
    %149 = tpu.concatenate %43, %78, %113, %148 in 1 : vector<12x8xf32>, vector<12x8xf32>, vector<12x8xf32>, vector<12x8xf32> -> vector<12x32xf32>
    %c0_46 = arith.constant 0 : index
    %c0_47 = arith.constant 0 : index
    %150 = vector.load %arg6[%c0_46, %c0_47] : memref<12x32xf32, #tpu.memory_space<vmem>>, vector<12x32xf32>
    tpu.vector_store %arg6[%c0_46, %c0_47], %149 {strides = array<i32>} : memref<12x32xf32, #tpu.memory_space<vmem>>, vector<12x32xf32>,
    return
  }
  func.func @transform_0(%arg0: i32) -> (i32, i32) {
    %c0_i32 = arith.constant 0 : i32
    %c0_i32_0 = arith.constant 0 : i32
    %c0_i32_1 = arith.constant 0 : i32
    return %c0_i32, %c0_i32_0 : i32, i32
  }
  func.func @transform_1(%arg0: i32) -> (i32, i32) {
    %c0_i32 = arith.constant 0 : i32
    %c0_i32_0 = arith.constant 0 : i32
    %c0_i32_1 = arith.constant 0 : i32
    return %c0_i32, %c0_i32_0 : i32, i32
  }
  func.func @transform_2(%arg0: i32) -> (i32, i32) {
    %c0_i32 = arith.constant 0 : i32
    %c0_i32_0 = arith.constant 0 : i32
    %c0_i32_1 = arith.constant 0 : i32
    return %c0_i32, %c0_i32_0 : i32, i32
  }
  func.func @transform_3(%arg0: i32) -> (i32, i32) {
    %c0_i32 = arith.constant 0 : i32
    %c0_i32_0 = arith.constant 0 : i32
    %c0_i32_1 = arith.constant 0 : i32
    return %c0_i32, %c0_i32_0 : i32, i32
  }
  func.func @transform_4(%arg0: i32) -> (i32, i32) {
    %c0_i32 = arith.constant 0 : i32
    %c0_i32_0 = arith.constant 0 : i32
    %c0_i32_1 = arith.constant 0 : i32
    return %c0_i32, %c0_i32_0 : i32, i32
  }
  func.func @transform_5(%arg0: i32) -> (i32, i32) {
    %c0_i32 = arith.constant 0 : i32
    %c0_i32_0 = arith.constant 0 : i32
    %c0_i32_1 = arith.constant 0 : i32
    return %c0_i32, %c0_i32_0 : i32, i32
  }
}

module attributes {stable_mosaic.version = 11 : i64} {
  func.func @_lora_gat_layer_kernel(%arg0: i32, %arg1: memref<12x32xf32, #tpu.memory_space<vmem>>, %arg2: memref<32x32xf32, #tpu.memory_space<vmem>>, %arg3: memref<12x12xi8, #tpu.memory_space<vmem>>, %arg4: memref<4x8xf32, #tpu.memory_space<vmem>>, %arg5: memref<4x8xf32, #tpu.memory_space<vmem>>, %arg6: memref<12x8xf32, #tpu.memory_space<vmem>>) attributes {dimension_semantics = [#tpu.dimension_semantics<arbitrary>], iteration_bounds = array<i64: 1>, scalar_prefetch = 0 : i64, scratch_operands = 0 : i64, tpu.core_type = #tpu.core_type<tc>, window_params = [{pipeline_mode = #tpu.pipeline_mode<synchronous>, transform_indices = @transform_0, window_bounds = array<i64: 12, 32>}, {pipeline_mode = #tpu.pipeline_mode<synchronous>, transform_indices = @transform_1, window_bounds = array<i64: 32, 32>}, {pipeline_mode = #tpu.pipeline_mode<synchronous>, transform_indices = @transform_2, window_bounds = array<i64: 12, 12>}, {pipeline_mode = #tpu.pipeline_mode<synchronous>, transform_indices = @transform_3, window_bounds = array<i64: 4, 8>}, {pipeline_mode = #tpu.pipeline_mode<synchronous>, transform_indices = @transform_4, window_bounds = array<i64: 4, 8>}, {pipeline_mode = #tpu.pipeline_mode<synchronous>, transform_indices = @transform_5, window_bounds = array<i64: 12, 8>}]} {
    %c0 = arith.constant 0 : index
    %c0_0 = arith.constant 0 : index
    %0 = vector.load %arg1[%c0, %c0_0] : memref<12x32xf32, #tpu.memory_space<vmem>>, vector<12x32xf32>
    %c0_1 = arith.constant 0 : index
    %c0_2 = arith.constant 0 : index
    %1 = vector.load %arg2[%c0_1, %c0_2] : memref<32x32xf32, #tpu.memory_space<vmem>>, vector<32x32xf32>
    %cst = arith.constant dense<0.000000e+00> : vector<12x32xf32>
    %2 = tpu.matmul %0, %1, %cst {dimension_numbers = #tpu.dot_dimension_numbers<[1], [0], [0], [1], [0, 0, 1, 1], [], []>} : vector<12x32xf32>, vector<32x32xf32>, vector<12x32xf32> -> vector<12x32xf32>
    %c0_3 = arith.constant 0 : index
    %c0_4 = arith.constant 0 : index
    %3 = vector.load %arg3[%c0_3, %c0_4] : memref<12x12xi8, #tpu.memory_space<vmem>>, vector<12x12xi8>
    %4 = arith.sitofp %3 : vector<12x12xi8> to vector<12x12xf32>
    %cst_5 = arith.constant 0.000000e+00 : f32
    %5 = vector.broadcast %cst_5 : f32 to vector<12x12xf32>
    %6 = arith.cmpf ogt, %4, %5 : vector<12x12xf32>
    %c0_6 = arith.constant 0 : index
    %c0_7 = arith.constant 0 : index
    %7 = vector.load %arg4[%c0_6, %c0_7] : memref<4x8xf32, #tpu.memory_space<vmem>>, vector<4x8xf32>
    %c0_8 = arith.constant 0 : index
    %c0_9 = arith.constant 0 : index
    %8 = vector.load %arg5[%c0_8, %c0_9] : memref<4x8xf32, #tpu.memory_space<vmem>>, vector<4x8xf32>
    %9 = vector.extract_strided_slice %2 {offsets = [0, 0], sizes = [12, 8], strides = [1, 1]} : vector<12x32xf32> to vector<12x8xf32>
    %10 = vector.extract_strided_slice %7 {offsets = [0, 0], sizes = [1, 8], strides = [1, 1]} : vector<4x8xf32> to vector<1x8xf32>
    %11 = vector.broadcast %10 : vector<1x8xf32> to vector<12x8xf32>
    %12 = arith.mulf %9, %11 : vector<12x8xf32>
    %cst_10 = arith.constant dense<0.000000e+00> : vector<12xf32>
    %13 = vector.multi_reduction <add>, %12, %cst_10 [1] : vector<12x8xf32> to vector<12xf32>
    %14 = vector.shape_cast %13 : vector<12xf32> to vector<12x1xf32>
    %15 = vector.extract_strided_slice %8 {offsets = [0, 0], sizes = [1, 8], strides = [1, 1]} : vector<4x8xf32> to vector<1x8xf32>
    %16 = vector.broadcast %15 : vector<1x8xf32> to vector<12x8xf32>
    %17 = arith.mulf %9, %16 : vector<12x8xf32>
    %cst_11 = arith.constant dense<0.000000e+00> : vector<12xf32>
    %18 = vector.multi_reduction <add>, %17, %cst_11 [1] : vector<12x8xf32> to vector<12xf32>
    %19 = vector.shape_cast %18 : vector<12xf32> to vector<12x1xf32>
    %20 = vector.shape_cast %19 : vector<12x1xf32> to vector<1x12xf32>
    %21 = vector.broadcast %14 : vector<12x1xf32> to vector<12x12xf32>
    %22 = vector.broadcast %20 : vector<1x12xf32> to vector<12x12xf32>
    %23 = arith.addf %21, %22 : vector<12x12xf32>
    %cst_12 = arith.constant 0.000000e+00 : f32
    %24 = vector.broadcast %cst_12 : f32 to vector<12x12xf32>
    %25 = arith.cmpf ogt, %23, %24 : vector<12x12xf32>
    %cst_13 = arith.constant 2.000000e-01 : f32
    %26 = vector.broadcast %cst_13 : f32 to vector<12x12xf32>
    %27 = arith.mulf %26, %23 : vector<12x12xf32>
    %28 = arith.select %25, %23, %27 : vector<12x12xi1>, vector<12x12xf32>
    %cst_14 = arith.constant -1.000000e+30 : f32
    %29 = vector.broadcast %cst_14 : f32 to vector<12x12xf32>
    %30 = arith.select %6, %28, %29 : vector<12x12xi1>, vector<12x12xf32>
    %cst_15 = arith.constant dense<0xFF800000> : vector<12xf32>
    %31 = vector.multi_reduction <maximumf>, %30, %cst_15 [1] : vector<12x12xf32> to vector<12xf32>
    %32 = vector.shape_cast %31 : vector<12xf32> to vector<12x1xf32>
    %33 = vector.broadcast %32 : vector<12x1xf32> to vector<12x12xf32>
    %34 = arith.subf %30, %33 : vector<12x12xf32>
    %35 = math.exp %34 : vector<12x12xf32>
    %cst_16 = arith.constant 0.000000e+00 : f32
    %36 = vector.broadcast %cst_16 : f32 to vector<12x12xf32>
    %37 = arith.select %6, %35, %36 : vector<12x12xi1>, vector<12x12xf32>
    %cst_17 = arith.constant dense<0.000000e+00> : vector<12xf32>
    %38 = vector.multi_reduction <add>, %37, %cst_17 [1] : vector<12x12xf32> to vector<12xf32>
    %39 = vector.shape_cast %38 : vector<12xf32> to vector<12x1xf32>
    %40 = tpu.reciprocal %39 {approx = true} : vector<12x1xf32> -> vector<12x1xf32>
    %41 = vector.broadcast %40 : vector<12x1xf32> to vector<12x12xf32>
    %42 = arith.mulf %37, %41 : vector<12x12xf32>
    %cst_18 = arith.constant dense<0.000000e+00> : vector<12x8xf32>
    %43 = tpu.matmul %42, %9, %cst_18 {dimension_numbers = #tpu.dot_dimension_numbers<[1], [0], [0], [1], [0, 0, 1, 1], [], []>} : vector<12x12xf32>, vector<12x8xf32>, vector<12x8xf32> -> vector<12x8xf32>
    %44 = vector.extract_strided_slice %2 {offsets = [0, 8], sizes = [12, 8], strides = [1, 1]} : vector<12x32xf32> to vector<12x8xf32>
    %45 = vector.extract_strided_slice %7 {offsets = [1, 0], sizes = [1, 8], strides = [1, 1]} : vector<4x8xf32> to vector<1x8xf32>
    %46 = vector.broadcast %45 : vector<1x8xf32> to vector<12x8xf32>
    %47 = arith.mulf %44, %46 : vector<12x8xf32>
    %cst_19 = arith.constant dense<0.000000e+00> : vector<12xf32>
    %48 = vector.multi_reduction <add>, %47, %cst_19 [1] : vector<12x8xf32> to vector<12xf32>
    %49 = vector.shape_cast %48 : vector<12xf32> to vector<12x1xf32>
    %50 = vector.extract_strided_slice %8 {offsets = [1, 0], sizes = [1, 8], strides = [1, 1]} : vector<4x8xf32> to vector<1x8xf32>
    %51 = vector.broadcast %50 : vector<1x8xf32> to vector<12x8xf32>
    %52 = arith.mulf %44, %51 : vector<12x8xf32>
    %cst_20 = arith.constant dense<0.000000e+00> : vector<12xf32>
    %53 = vector.multi_reduction <add>, %52, %cst_20 [1] : vector<12x8xf32> to vector<12xf32>
    %54 = vector.shape_cast %53 : vector<12xf32> to vector<12x1xf32>
    %55 = vector.shape_cast %54 : vector<12x1xf32> to vector<1x12xf32>
    %56 = vector.broadcast %49 : vector<12x1xf32> to vector<12x12xf32>
    %57 = vector.broadcast %55 : vector<1x12xf32> to vector<12x12xf32>
    %58 = arith.addf %56, %57 : vector<12x12xf32>
    %cst_21 = arith.constant 0.000000e+00 : f32
    %59 = vector.broadcast %cst_21 : f32 to vector<12x12xf32>
    %60 = arith.cmpf ogt, %58, %59 : vector<12x12xf32>
    %cst_22 = arith.constant 2.000000e-01 : f32
    %61 = vector.broadcast %cst_22 : f32 to vector<12x12xf32>
    %62 = arith.mulf %61, %58 : vector<12x12xf32>
    %63 = arith.select %60, %58, %62 : vector<12x12xi1>, vector<12x12xf32>
    %cst_23 = arith.constant -1.000000e+30 : f32
    %64 = vector.broadcast %cst_23 : f32 to vector<12x12xf32>
    %65 = arith.select %6, %63, %64 : vector<12x12xi1>, vector<12x12xf32>
    %cst_24 = arith.constant dense<0xFF800000> : vector<12xf32>
    %66 = vector.multi_reduction <maximumf>, %65, %cst_24 [1] : vector<12x12xf32> to vector<12xf32>
    %67 = vector.shape_cast %66 : vector<12xf32> to vector<12x1xf32>
    %68 = vector.broadcast %67 : vector<12x1xf32> to vector<12x12xf32>
    %69 = arith.subf %65, %68 : vector<12x12xf32>
    %70 = math.exp %69 : vector<12x12xf32>
    %cst_25 = arith.constant 0.000000e+00 : f32
    %71 = vector.broadcast %cst_25 : f32 to vector<12x12xf32>
    %72 = arith.select %6, %70, %71 : vector<12x12xi1>, vector<12x12xf32>
    %cst_26 = arith.constant dense<0.000000e+00> : vector<12xf32>
    %73 = vector.multi_reduction <add>, %72, %cst_26 [1] : vector<12x12xf32> to vector<12xf32>
    %74 = vector.shape_cast %73 : vector<12xf32> to vector<12x1xf32>
    %75 = tpu.reciprocal %74 {approx = true} : vector<12x1xf32> -> vector<12x1xf32>
    %76 = vector.broadcast %75 : vector<12x1xf32> to vector<12x12xf32>
    %77 = arith.mulf %72, %76 : vector<12x12xf32>
    %cst_27 = arith.constant dense<0.000000e+00> : vector<12x8xf32>
    %78 = tpu.matmul %77, %44, %cst_27 {dimension_numbers = #tpu.dot_dimension_numbers<[1], [0], [0], [1], [0, 0, 1, 1], [], []>} : vector<12x12xf32>, vector<12x8xf32>, vector<12x8xf32> -> vector<12x8xf32>
    %79 = vector.extract_strided_slice %2 {offsets = [0, 16], sizes = [12, 8], strides = [1, 1]} : vector<12x32xf32> to vector<12x8xf32>
    %80 = vector.extract_strided_slice %7 {offsets = [2, 0], sizes = [1, 8], strides = [1, 1]} : vector<4x8xf32> to vector<1x8xf32>
    %81 = vector.broadcast %80 : vector<1x8xf32> to vector<12x8xf32>
    %82 = arith.mulf %79, %81 : vector<12x8xf32>
    %cst_28 = arith.constant dense<0.000000e+00> : vector<12xf32>
    %83 = vector.multi_reduction <add>, %82, %cst_28 [1] : vector<12x8xf32> to vector<12xf32>
    %84 = vector.shape_cast %83 : vector<12xf32> to vector<12x1xf32>
    %85 = vector.extract_strided_slice %8 {offsets = [2, 0], sizes = [1, 8], strides = [1, 1]} : vector<4x8xf32> to vector<1x8xf32>
    %86 = vector.broadcast %85 : vector<1x8xf32> to vector<12x8xf32>
    %87 = arith.mulf %79, %86 : vector<12x8xf32>
    %cst_29 = arith.constant dense<0.000000e+00> : vector<12xf32>
    %88 = vector.multi_reduction <add>, %87, %cst_29 [1] : vector<12x8xf32> to vector<12xf32>
    %89 = vector.shape_cast %88 : vector<12xf32> to vector<12x1xf32>
    %90 = vector.shape_cast %89 : vector<12x1xf32> to vector<1x12xf32>
    %91 = vector.broadcast %84 : vector<12x1xf32> to vector<12x12xf32>
    %92 = vector.broadcast %90 : vector<1x12xf32> to vector<12x12xf32>
    %93 = arith.addf %91, %92 : vector<12x12xf32>
    %cst_30 = arith.constant 0.000000e+00 : f32
    %94 = vector.broadcast %cst_30 : f32 to vector<12x12xf32>
    %95 = arith.cmpf ogt, %93, %94 : vector<12x12xf32>
    %cst_31 = arith.constant 2.000000e-01 : f32
    %96 = vector.broadcast %cst_31 : f32 to vector<12x12xf32>
    %97 = arith.mulf %96, %93 : vector<12x12xf32>
    %98 = arith.select %95, %93, %97 : vector<12x12xi1>, vector<12x12xf32>
    %cst_32 = arith.constant -1.000000e+30 : f32
    %99 = vector.broadcast %cst_32 : f32 to vector<12x12xf32>
    %100 = arith.select %6, %98, %99 : vector<12x12xi1>, vector<12x12xf32>
    %cst_33 = arith.constant dense<0xFF800000> : vector<12xf32>
    %101 = vector.multi_reduction <maximumf>, %100, %cst_33 [1] : vector<12x12xf32> to vector<12xf32>
    %102 = vector.shape_cast %101 : vector<12xf32> to vector<12x1xf32>
    %103 = vector.broadcast %102 : vector<12x1xf32> to vector<12x12xf32>
    %104 = arith.subf %100, %103 : vector<12x12xf32>
    %105 = math.exp %104 : vector<12x12xf32>
    %cst_34 = arith.constant 0.000000e+00 : f32
    %106 = vector.broadcast %cst_34 : f32 to vector<12x12xf32>
    %107 = arith.select %6, %105, %106 : vector<12x12xi1>, vector<12x12xf32>
    %cst_35 = arith.constant dense<0.000000e+00> : vector<12xf32>
    %108 = vector.multi_reduction <add>, %107, %cst_35 [1] : vector<12x12xf32> to vector<12xf32>
    %109 = vector.shape_cast %108 : vector<12xf32> to vector<12x1xf32>
    %110 = tpu.reciprocal %109 {approx = true} : vector<12x1xf32> -> vector<12x1xf32>
    %111 = vector.broadcast %110 : vector<12x1xf32> to vector<12x12xf32>
    %112 = arith.mulf %107, %111 : vector<12x12xf32>
    %cst_36 = arith.constant dense<0.000000e+00> : vector<12x8xf32>
    %113 = tpu.matmul %112, %79, %cst_36 {dimension_numbers = #tpu.dot_dimension_numbers<[1], [0], [0], [1], [0, 0, 1, 1], [], []>} : vector<12x12xf32>, vector<12x8xf32>, vector<12x8xf32> -> vector<12x8xf32>
    %114 = vector.extract_strided_slice %2 {offsets = [0, 24], sizes = [12, 8], strides = [1, 1]} : vector<12x32xf32> to vector<12x8xf32>
    %115 = vector.extract_strided_slice %7 {offsets = [3, 0], sizes = [1, 8], strides = [1, 1]} : vector<4x8xf32> to vector<1x8xf32>
    %116 = vector.broadcast %115 : vector<1x8xf32> to vector<12x8xf32>
    %117 = arith.mulf %114, %116 : vector<12x8xf32>
    %cst_37 = arith.constant dense<0.000000e+00> : vector<12xf32>
    %118 = vector.multi_reduction <add>, %117, %cst_37 [1] : vector<12x8xf32> to vector<12xf32>
    %119 = vector.shape_cast %118 : vector<12xf32> to vector<12x1xf32>
    %120 = vector.extract_strided_slice %8 {offsets = [3, 0], sizes = [1, 8], strides = [1, 1]} : vector<4x8xf32> to vector<1x8xf32>
    %121 = vector.broadcast %120 : vector<1x8xf32> to vector<12x8xf32>
    %122 = arith.mulf %114, %121 : vector<12x8xf32>
    %cst_38 = arith.constant dense<0.000000e+00> : vector<12xf32>
    %123 = vector.multi_reduction <add>, %122, %cst_38 [1] : vector<12x8xf32> to vector<12xf32>
    %124 = vector.shape_cast %123 : vector<12xf32> to vector<12x1xf32>
    %125 = vector.shape_cast %124 : vector<12x1xf32> to vector<1x12xf32>
    %126 = vector.broadcast %119 : vector<12x1xf32> to vector<12x12xf32>
    %127 = vector.broadcast %125 : vector<1x12xf32> to vector<12x12xf32>
    %128 = arith.addf %126, %127 : vector<12x12xf32>
    %cst_39 = arith.constant 0.000000e+00 : f32
    %129 = vector.broadcast %cst_39 : f32 to vector<12x12xf32>
    %130 = arith.cmpf ogt, %128, %129 : vector<12x12xf32>
    %cst_40 = arith.constant 2.000000e-01 : f32
    %131 = vector.broadcast %cst_40 : f32 to vector<12x12xf32>
    %132 = arith.mulf %131, %128 : vector<12x12xf32>
    %133 = arith.select %130, %128, %132 : vector<12x12xi1>, vector<12x12xf32>
    %cst_41 = arith.constant -1.000000e+30 : f32
    %134 = vector.broadcast %cst_41 : f32 to vector<12x12xf32>
    %135 = arith.select %6, %133, %134 : vector<12x12xi1>, vector<12x12xf32>
    %cst_42 = arith.constant dense<0xFF800000> : vector<12xf32>
    %136 = vector.multi_reduction <maximumf>, %135, %cst_42 [1] : vector<12x12xf32> to vector<12xf32>
    %137 = vector.shape_cast %136 : vector<12xf32> to vector<12x1xf32>
    %138 = vector.broadcast %137 : vector<12x1xf32> to vector<12x12xf32>
    %139 = arith.subf %135, %138 : vector<12x12xf32>
    %140 = math.exp %139 : vector<12x12xf32>
    %cst_43 = arith.constant 0.000000e+00 : f32
    %141 = vector.broadcast %cst_43 : f32 to vector<12x12xf32>
    %142 = arith.select %6, %140, %141 : vector<12x12xi1>, vector<12x12xf32>
    %cst_44 = arith.constant dense<0.000000e+00> : vector<12xf32>
    %143 = vector.multi_reduction <add>, %142, %cst_44 [1] : vector<12x12xf32> to vector<12xf32>
    %144 = vector.shape_cast %143 : vector<12xf32> to vector<12x1xf32>
    %145 = tpu.reciprocal %144 {approx = true} : vector<12x1xf32> -> vector<12x1xf32>
    %146 = vector.broadcast %145 : vector<12x1xf32> to vector<12x12xf32>
    %147 = arith.mulf %142, %146 : vector<12x12xf32>
    %cst_45 = arith.constant dense<0.000000e+00> : vector<12x8xf32>
    %148 = tpu.matmul %147, %114, %cst_45 {dimension_numbers = #tpu.dot_dimension_numbers<[1], [0], [0], [1], [0, 0, 1, 1], [], []>} : vector<12x12xf32>, vector<12x8xf32>, vector<12x8xf32> -> vector<12x8xf32>
    %149 = arith.addf %43, %78 : vector<12x8xf32>
    %150 = arith.addf %149, %113 : vector<12x8xf32>
    %151 = arith.addf %150, %148 : vector<12x8xf32>
    %cst_46 = arith.constant 2.500000e-01 : f32
    %152 = vector.broadcast %cst_46 : f32 to vector<12x8xf32>
    %153 = arith.mulf %151, %152 : vector<12x8xf32>
    %c0_47 = arith.constant 0 : index
    %c0_48 = arith.constant 0 : index
    %154 = vector.load %arg6[%c0_47, %c0_48] : memref<12x8xf32, #tpu.memory_space<vmem>>, vector<12x8xf32>
    tpu.vector_store %arg6[%c0_47, %c0_48], %153 {strides = array<i32>} : memref<12x8xf32, #tpu.memory_space<vmem>>, vector<12x8xf32>,
    return
  }
  func.func @transform_0(%arg0: i32) -> (i32, i32) {
    %c0_i32 = arith.constant 0 : i32
    %c0_i32_0 = arith.constant 0 : i32
    %c0_i32_1 = arith.constant 0 : i32
    return %c0_i32, %c0_i32_0 : i32, i32
  }
  func.func @transform_1(%arg0: i32) -> (i32, i32) {
    %c0_i32 = arith.constant 0 : i32
    %c0_i32_0 = arith.constant 0 : i32
    %c0_i32_1 = arith.constant 0 : i32
    return %c0_i32, %c0_i32_0 : i32, i32
  }
  func.func @transform_2(%arg0: i32) -> (i32, i32) {
    %c0_i32 = arith.constant 0 : i32
    %c0_i32_0 = arith.constant 0 : i32
    %c0_i32_1 = arith.constant 0 : i32
    return %c0_i32, %c0_i32_0 : i32, i32
  }
  func.func @transform_3(%arg0: i32) -> (i32, i32) {
    %c0_i32 = arith.constant 0 : i32
    %c0_i32_0 = arith.constant 0 : i32
    %c0_i32_1 = arith.constant 0 : i32
    return %c0_i32, %c0_i32_0 : i32, i32
  }
  func.func @transform_4(%arg0: i32) -> (i32, i32) {
    %c0_i32 = arith.constant 0 : i32
    %c0_i32_0 = arith.constant 0 : i32
    %c0_i32_1 = arith.constant 0 : i32
    return %c0_i32, %c0_i32_0 : i32, i32
  }
  func.func @transform_5(%arg0: i32) -> (i32, i32) {
    %c0_i32 = arith.constant 0 : i32
    %c0_i32_0 = arith.constant 0 : i32
    %c0_i32_1 = arith.constant 0 : i32
    return %c0_i32, %c0_i32_0 : i32, i32
  }
}

</mosaic_0001>

<bundles_post_ra>
// kernel: _lambda_.2
= control target key start
LH: loop header
LB: loop body
LE: loop exit
PB: predicated region body
PF: predicated region fallthrough
CT: control target
= control target key end

     0   :  { %10 = vsyncpa [#allocation3], 0  ;;  %s1114_s0 = inlined_call_operand.hbm [shape: f32[12,16], index: 0, kind: input, shape index: {}]   ;;  %s1115_s1 = inlined_call_operand.hbm [shape: f32[16,32], index: 1, kind: input, shape index: {}]   ;;  %s1116_s2 = inlined_call_operand.hbm [shape: s8[12,12], index: 2, kind: input, shape index: {}]   ;;  %s1117_s3 = inlined_call_operand.hbm [shape: f32[4,8], index: 3, kind: input, shape index: {}]   ;;  %s1118_s4 = inlined_call_operand.hbm [shape: f32[4,8], index: 4, kind: input, shape index: {}]   ;;  %s1119_s5 = inlined_call_operand.vmem [shape: f32[12,32], index: 5, kind: output, shape index: {}]  }
   0x1   :  { %11 = vsyncpa [#allocation5], 0 }
   0x2   :  { %12 = vsyncpa [#allocation8], 0  ;;  %s30_s20 = sshll.u32 %s1115_s1, 4  ;;  %s856_s21 = smov [#allocation4]   ;;  %s31_s20 = int_to_ptr.hbm [resolvable:$true] %s30_s20 }
   0x3   :  { %s32_s22 = sshll.u32 %s856_s21, 4  ;;  %s57_s25 = sshll.u32 %s1117_s3, 4  ;;  %s33_s22 = int_to_ptr.vmem [resolvable:$true] %s32_s22  ;;  %s58_s25 = int_to_ptr.hbm [resolvable:$true] %s57_s25 }
   0x4   :  { %s857_s26 = smov 128   ;;  %s858_s27 = smov 8  }
   0x5   :  { %38 = dma.hbm_to_vmem [thread:$0]  %s31_s20, 256, %s33_s22, [#allocation5], %s857_s26, %s857_s26, %s858_s27  }
   0x6   :  { %s859_s28 = smov [#allocation7]   ;;  %s17_s7 = sshll.u32 %s1114_s0, 4  ;;  %s18_s7 = int_to_ptr.hbm [resolvable:$true] %s17_s7 }
   0x7   :  { %s59_s29 = sshll.u32 %s859_s28, 4  ;;  %s43_s9 = sshll.u32 %s1116_s2, 4  ;;  %s60_s29 = int_to_ptr.vmem [resolvable:$true] %s59_s29  ;;  %s44_s9 = int_to_ptr.hbm [resolvable:$true] %s43_s9 }
   0x8   :  { %62 = dma.hbm_to_vmem [thread:$0]  %s58_s25, 64, %s60_s29, [#allocation8]  }
   0x9   :  { %s860_s10 = smov [#allocation2]   ;;  %s861_s11 = smov [#allocation6]  }
   0xa   :  { %s19_s3 = sshll.u32 %s860_s10, 4  ;;  %s45_s12 = sshll.u32 %s861_s11, 4  ;;  %s20_s3 = int_to_ptr.vmem [resolvable:$true] %s19_s3  ;;  %s46_s12 = int_to_ptr.vmem [resolvable:$true] %s45_s12 }
   0xb   :  { %25 = dma.hbm_to_vmem [thread:$0]  %s18_s7, 256, %s20_s3, [#allocation3], %s857_s26, %s857_s26, %s858_s27  }
   0xc   :  { %s862_s13 = smov 32   ;;  %s863_s14 = smov 2  }
   0xd   :  { %51 = dma.hbm_to_vmem [thread:$0]  %s44_s9, 64, %s46_s12, [#allocation5], %s862_s13, %s862_s13, %s863_s14  }
   0xe   :  { %s68_s16 = sshll.u32 %s1118_s4, 4  ;;  %s864_s17 = smov [#allocation9]   ;;  %s69_s16 = int_to_ptr.hbm [resolvable:$true] %s68_s16 }
   0xf   :  { %s70_s18 = sshll.u32 %s864_s17, 4  ;;  %s71_s18 = int_to_ptr.vmem [resolvable:$true] %s70_s18 }
  0x10   :  { %73 = dma.hbm_to_vmem [thread:$0]  %s69_s16, 64, %s71_s18, [#allocation8]  }
  0x11   :  { %850 = dma.done.wait [#allocation3], 256  }
  0x12   :  { %851 = vsyncadd [#allocation3], 4294967040 }
  0x13   :  { %852 = dma.done.wait [#allocation5], 320  }
  0x14   :  { %853 = vsyncadd [#allocation5], 4294966976 }
  0x15   :  { %854 = dma.done.wait [#allocation8], 128  }
  0x16   :  { %855 = vsyncadd [#allocation8], 4294967168  ;;  %v97_v0 = vld [vmem:[#allocation4 + $0x8] sm:$0xff]  ;;  %v96_v1 = vld [vmem:[#allocation4] sm:$0xff]  ;;  %vm98_vm0 = vcmask 130048   ;;  %s865_s2 = smov 24  }
  0x17   :  { %v94_v2 = vld [vmem:[#allocation2] sm:$0xff]  ;;  %119 = vmatpush.msra.mxu0 %v97_v0  ;;  %682 = vmatpush.msra.mxu1 %v97_v0  ;;  %v95_v3 = vld [vmem:[#allocation2 + $0x8] sm:$0xf]  ;;  %s866_s4 = smov 16   ;;  %vm223_vm1 = vcmask 1043456   ;;  %s867_s19 = smov 120  }
  0x18   :  { %v137_v4 = vld [vmem:[#allocation9] sm:$0xf]  ;;  %v917_v5 = vld [vmem:[#allocation7] sm:$0xf]  ;;  %s868_s20 = smov 112   ;;  %s869_s21 = smov 104  }
  0x19   :  { %v271_v6 = vperm.slane %v137_v4, 1  ;;  %v250_v7 = vperm.slane %v917_v5, 1  ;;  %120 = vmatpush.msra.mxu0 %v96_v1  ;;  %683 = vmatpush.msra.mxu1 %v96_v1  ;;  %v522_v8 = vperm.slane %v137_v4, 3  ;;  %v397_v9 = vperm.slane %v137_v4, 2 }
  0x1a   :  { %668 = vmatmul.msk.f32.vlgmr.msra.gmra.mxu0 %vm98_vm0, %v94_v2  ;;  %669 = vmatmul.msk.f32.vlgmr.msra.gmra.mxu1 %vm98_vm0, %v95_v3  ;;  %v376_v10 = vperm.slane %v917_v5, 2  ;;  %v501_v11 = vperm.slane %v917_v5, 3  ;;  %v149_v32 = vperm.slane %v137_v4, 0  ;;  %vm141_vm2 = vcmask 64512  }
  0x1b   :  { %273 = vrot.lane.b32.xlu0 %v271_v6, %s858_s27  ;;  %252 = vrot.lane.b32.xlu1 %v250_v7, %s858_s27  ;;  %vm145_vm3 = vcmask 60416   ;;  %v138_v61 = vperm.slane %v917_v5, 0  ;;  %v160_v3 = vlaneseq  ;;  %vm165_vm4 = vcmask 130112  }
  0x1c   :  { %524 = vrot.lane.b32.xlu2 %v522_v8, %s865_s2  ;;  %vm191_vm7 = vcmask 97280   ;;  %vm195_vm10 = vcmask 93184  }
  0x1d   :  { %v982_v4 = vand.u32 127, %v160_v3 }
  0x1f   :  { %v163_v5 = vadd.s32 4294967288, %v982_v4 }
  0x23   :  { %399 = vrot.lane.b32.xlu0 %v397_v9, %s866_s4  ;;  %378 = vrot.lane.b32.xlu1 %v376_v10, %s866_s4  ;;  %v128_v9 = vld [vmem:[#allocation6] sm:$0x3] }
  0x24   :  { %503 = vrot.lane.b32.xlu2 %v501_v11, %s865_s2  ;;  %v130_v10 = vunpack.c.0.s8 %v128_v9 }
  0x76   :  { %v525_v24 = vpop.permute.xlu2 %524 }
  0x7e   :  { %v504_v28 = vpop.permute.xlu2 %503 }
  0x8d   :  { %v274_v12 = vpop.permute.xlu0 %273  ;;  %v253_v13 = vpop.permute.xlu1 %252 }
  0x95   :  { %v400_v14 = vpop.permute.xlu0 %399  ;;  %v379_v20 = vpop.permute.xlu1 %378 }
  0x97   :  { %v930_v15 = vpop.f32.mrf.mxu0  ;;  %v932_v16 = vpop.f32.mrf.mxu1 }
  0x98   :  { %670 = vmatpush.msk.msrb.mxu1 %vm223_vm1, %v932_v16  ;;  %v277_v17 = vmul.f32 %v274_v12, %v932_v16  ;;  %v402_v18 = vmul.f32 %v400_v14, %v930_v15  ;;  %v276_v19 = vmul.f32 %v274_v12, %v930_v15  ;;  %v381_v21 = vmul.f32 %v379_v20, %v930_v15 }
  0x99   :  { %v255_v22 = vmul.f32 %v253_v13, %v930_v15  ;;  %v403_v23 = vmul.f32 %v400_v14, %v932_v16  ;;  %v527_v25 = vmul.f32 %v525_v24, %v930_v15  ;;  %v256_v26 = vmul.f32 %v253_v13, %v932_v16 }
  0x9a   :  { %282 = vrot.lane.b32.xlu1 %v277_v17, %s867_s19  ;;  %406 = vrot.lane.b32.xlu2 %v402_v18, %s868_s20  ;;  %v528_v27 = vmul.f32 %v525_v24, %v932_v16  ;;  %v506_v29 = vmul.f32 %v504_v28, %v930_v15  ;;  %v507_v30 = vmul.f32 %v504_v28, %v932_v16  ;;  %v986_v17 = vcvt.s32.f32 %v130_v10  ;;  %v129_v18 = vld [vmem:[#allocation6 + $0x2] sm:$0x1] }
  0x9b   :  { %280 = vrot.lane.b32.xlu0 %v276_v19, %s867_s19  ;;  %242 = vmatpush.msrb.mxu1 %v930_v15  ;;  %v382_v31 = vmul.f32 %v379_v20, %v932_v16  ;;  %v150_v33 = vmul.f32 %v149_v32, %v930_v15  ;;  %v151_v34 = vmul.f32 %v149_v32, %v932_v16 }
  0x9c   :  { %v139_v62 = vmul.f32 %v138_v61, %v930_v15  ;;  %v140_v0 = vmul.f32 %v138_v61, %v932_v16  ;;  %vm134_vm5 = vcmp.gt.f32.partialorder %v986_v17, 0.0 }
  0x9d   :  { %v152_v35 = vsel %vm141_vm2, %v150_v33, 0.0  ;;  %v155_v36 = vsel %vm145_vm3, %v151_v34, 0.0 }
  0x9e   :  { %v142_v63 = vsel %vm141_vm2, %v139_v62, 0.0  ;;  %v146_v1 = vsel %vm145_vm3, %v140_v0, 0.0 }
  0xa2   :  { %385 = vrot.lane.b32.xlu2 %v381_v21, %s868_s20  ;;  %259 = vrot.lane.b32.xlu1 %v255_v22, %s867_s19  ;;  %v131_v22 = vunpack.c.0.s8 %v129_v18 }
  0xa3   :  { %408 = vrot.lane.b32.xlu0 %v403_v23, %s868_s20 }
  0xaa   :  { %261 = vrot.lane.b32.xlu2 %v256_v26, %s867_s19  ;;  %533 = vrot.lane.b32.xlu1 %v528_v27, %s869_s21  ;;  %v994_v26 = vcvt.s32.f32 %v131_v22 }
  0xab   :  { %531 = vrot.lane.b32.xlu0 %v527_v25, %s869_s21 }
  0xac   :  { %vm135_vm8 = vcmp.gt.f32.partialorder %v994_v26, 0.0 }
  0xb2   :  { %512 = vrot.lane.b32.xlu2 %v507_v30, %s869_s21  ;;  %387 = vrot.lane.b32.xlu1 %v382_v31, %s868_s20 }
  0xb3   :  { %510 = vrot.lane.b32.xlu0 %v506_v29, %s869_s21 }
  0xdb   :  { %153 = vadd.xlane.f32.xlu2 %v152_v35 }
  0xdd   :  { %156 = vadd.xlane.f32.xlu0 %v155_v36 }
  0xf4   :  { %v407_v37 = vpop.permute.xlu2 %406 }
  0xf5   :  { %v412_v38 = vsel %vm141_vm2, %v407_v37, 0.0 }
  0xf6   :  { %413 = vadd.xlane.f32.xlu2 %v412_v38 }
  0xfc   :  { %v386_v42 = vpop.permute.xlu2 %385 }
  0xfd   :  { %v391_v46 = vsel %vm141_vm2, %v386_v42, 0.0 }
 0x104   :  { %v262_v49 = vpop.permute.xlu2 %261 }
 0x105   :  { %v268_v52 = vsel %vm145_vm3, %v262_v49, 0.0 }
 0x10c   :  { %v283_v39 = vpop.permute.xlu1 %282  ;;  %v513_v55 = vpop.permute.xlu2 %512 }
 0x10d   :  { %v281_v40 = vpop.permute.xlu0 %280  ;;  %v289_v41 = vsel %vm145_vm3, %v283_v39, 0.0  ;;  %v519_v58 = vsel %vm145_vm3, %v513_v55, 0.0 }
 0x10e   :  { %v286_v43 = vsel %vm141_vm2, %v281_v40, 0.0  ;;  %290 = vadd.xlane.f32.xlu1 %v289_v41 }
 0x10f   :  { %287 = vadd.xlane.f32.xlu0 %v286_v43 }
 0x114   :  { %v260_v44 = vpop.permute.xlu1 %259 }
 0x115   :  { %v409_v45 = vpop.permute.xlu0 %408  ;;  %v265_v47 = vsel %vm141_vm2, %v260_v44, 0.0 }
 0x116   :  { %392 = vadd.xlane.f32.xlu1 %v391_v46  ;;  %v415_v48 = vsel %vm145_vm3, %v409_v45, 0.0 }
 0x117   :  { %266 = vadd.xlane.f32.xlu0 %v265_v47  ;;  %416 = vadd.xlane.f32.xlu2 %v415_v48 }
 0x11c   :  { %v534_v50 = vpop.permute.xlu1 %533 }
 0x11d   :  { %v532_v51 = vpop.permute.xlu0 %531  ;;  %v540_v53 = vsel %vm145_vm3, %v534_v50, 0.0 }
 0x11e   :  { %269 = vadd.xlane.f32.xlu1 %v268_v52  ;;  %v537_v54 = vsel %vm141_vm2, %v532_v51, 0.0 }
 0x11f   :  { %541 = vadd.xlane.f32.xlu0 %v540_v53  ;;  %538 = vadd.xlane.f32.xlu2 %v537_v54 }
 0x124   :  { %v388_v56 = vpop.permute.xlu1 %387 }
 0x125   :  { %v511_v57 = vpop.permute.xlu0 %510  ;;  %v394_v59 = vsel %vm145_vm3, %v388_v56, 0.0 }
 0x126   :  { %520 = vadd.xlane.f32.xlu1 %v519_v58  ;;  %v516_v60 = vsel %vm141_vm2, %v511_v57, 0.0 }
 0x127   :  { %395 = vadd.xlane.f32.xlu0 %v394_v59  ;;  %517 = vadd.xlane.f32.xlu2 %v516_v60 }
 0x12e   :  { %143 = vadd.xlane.f32.xlu1 %v142_v63 }
 0x136   :  { %147 = vadd.xlane.f32.xlu1 %v146_v1 }
 0x14e   :  { %v154_v6 = vpop.xlane.xlu2 %153 }
 0x14f   :  { %v162_v37 = vperm.slane %v154_v6, %v982_v4 }
 0x150   :  { %v157_v2 = vpop.xlane.xlu0 %156 }
 0x151   :  { %v164_v38 = vperm.slane %v157_v2, %v163_v5 }
 0x153   :  { %v166_v43 = vsel %vm165_vm4, %v164_v38, %v162_v37 }
 0x169   :  { %v414_v13 = vpop.xlane.xlu2 %413 }
 0x16a   :  { %v420_v39 = vperm.slane %v414_v13, %v982_v4 }
 0x181   :  { %v291_v7 = vpop.xlane.xlu1 %290 }
 0x182   :  { %v288_v8 = vpop.xlane.xlu0 %287  ;;  %v295_v12 = vperm.slane %v291_v7, %v163_v5 }
 0x183   :  { %v294_v11 = vperm.slane %v288_v8, %v982_v4 }
 0x185   :  { %v296_v20 = vsel %vm165_vm4, %v295_v12, %v294_v11 }
 0x189   :  { %v393_v14 = vpop.xlane.xlu1 %392 }
 0x18a   :  { %v267_v19 = vpop.xlane.xlu0 %266  ;;  %v417_v30 = vpop.xlane.xlu2 %416 }
 0x18b   :  { %v305_v21 = vadd.f32 %v296_v20, %v267_v19  ;;  %v421_v36 = vperm.slane %v417_v30, %v163_v5 }
 0x18d   :  { %v309_v23 = vmul.f32 0.2, %v305_v21  ;;  %vm307_vm6 = vcmp.gt.f32.partialorder %v305_v21, 0.0  ;;  %v422_v42 = vsel %vm165_vm4, %v421_v36, %v420_v39 }
 0x18e   :  { %v431_v45 = vadd.f32 %v422_v42, %v393_v14 }
 0x18f   :  { %v311_v24 = vsel %vm307_vm6, %v305_v21, %v309_v23 }
 0x190   :  { %v992_v25 = vsel %vm134_vm5, %v311_v24, -1e+30  ;;  %v435_v51 = vmul.f32 0.2, %v431_v45  ;;  %vm433_vm12 = vcmp.gt.f32.partialorder %v431_v45, 0.0 }
 0x191   :  { %v270_v27 = vpop.xlane.xlu1 %269  ;;  %v315_v28 = vsel %vm191_vm7, %v992_v25, -inf }
 0x192   :  { %v306_v29 = vadd.f32 %v296_v20, %v270_v27  ;;  %316 = vmax.xlane.f32.xlu2 %v315_v28  ;;  %v542_v40 = vpop.xlane.xlu0 %541  ;;  %v539_v41 = vpop.xlane.xlu2 %538  ;;  %v437_v61 = vsel %vm433_vm12, %v431_v45, %v435_v51 }
 0x193   :  { %v546_v48 = vperm.slane %v542_v40, %v163_v5  ;;  %v545_v49 = vperm.slane %v539_v41, %v982_v4  ;;  %v439_v63 = vsel %vm134_vm5, %v437_v61, -1e+30 }
 0x194   :  { %v310_v31 = vmul.f32 0.2, %v306_v29  ;;  %vm308_vm9 = vcmp.gt.f32.partialorder %v306_v29, 0.0  ;;  %v441_v4 = vsel %vm191_vm7, %v439_v63, -inf }
 0x195   :  { %v547_v56 = vsel %vm165_vm4, %v546_v48, %v545_v49  ;;  %vm657_vm4 = vcmask 261120  }
 0x196   :  { %v312_v32 = vsel %vm308_vm9, %v306_v29, %v310_v31 }
 0x197   :  { %v1001_v33 = vsel %vm135_vm8, %v312_v32, -1e+30 }
 0x198   :  { %v318_v34 = vsel %vm195_vm10, %v1001_v33, -inf }
 0x199   :  { %v521_v35 = vpop.xlane.xlu1 %520 }
 0x19a   :  { %319 = vmax.xlane.f32.xlu2 %v318_v34  ;;  %v396_v52 = vpop.xlane.xlu0 %395  ;;  %v518_v53 = vpop.xlane.xlu2 %517  ;;  %v557_v12 = vadd.f32 %v547_v56, %v521_v35 }
 0x19b   :  { %v432_v58 = vadd.f32 %v422_v42, %v396_v52  ;;  %v556_v59 = vadd.f32 %v547_v56, %v518_v53 }
 0x19c   :  { %v561_v13 = vmul.f32 0.2, %v557_v12  ;;  %vm559_vm3 = vcmp.gt.f32.partialorder %v557_v12, 0.0 }
 0x19d   :  { %v436_v0 = vmul.f32 0.2, %v432_v58  ;;  %v560_v1 = vmul.f32 0.2, %v556_v59  ;;  %vm558_vm14 = vcmp.gt.f32.partialorder %v556_v59, 0.0  ;;  %vm434_vm15 = vcmp.gt.f32.partialorder %v432_v58, 0.0 }
 0x19e   :  { %v563_v14 = vsel %vm559_vm3, %v557_v12, %v561_v13 }
 0x19f   :  { %v562_v7 = vsel %vm558_vm14, %v556_v59, %v560_v1  ;;  %v438_v8 = vsel %vm434_vm15, %v432_v58, %v436_v0  ;;  %v1037_v18 = vsel %vm135_vm8, %v563_v14, -1e+30 }
 0x1a0   :  { %v564_v9 = vsel %vm134_vm5, %v562_v7, -1e+30  ;;  %v440_v5 = vsel %vm135_vm8, %v438_v8, -1e+30  ;;  %v569_v19 = vsel %vm195_vm10, %v1037_v18, -inf }
 0x1a1   :  { %v144_v44 = vpop.xlane.xlu1 %143  ;;  %v566_v10 = vsel %vm191_vm7, %v564_v9, -inf  ;;  %v444_v11 = vsel %vm195_vm10, %v440_v5, -inf }
 0x1a2   :  { %v181_v46 = vadd.f32 %v166_v43, %v144_v44 }
 0x1a4   :  { %v185_v47 = vmul.f32 0.2, %v181_v46  ;;  %vm183_vm11 = vcmp.gt.f32.partialorder %v181_v46, 0.0 }
 0x1a6   :  { %v187_v50 = vsel %vm183_vm11, %v181_v46, %v185_v47 }
 0x1a7   :  { %v1012_v54 = vsel %vm134_vm5, %v187_v50, -1e+30 }
 0x1a8   :  { %v192_v55 = vsel %vm191_vm7, %v1012_v54, -inf }
 0x1a9   :  { %193 = vmax.xlane.f32.xlu0 %v192_v55  ;;  %v148_v57 = vpop.xlane.xlu1 %147 }
 0x1aa   :  { %v182_v60 = vadd.f32 %v166_v43, %v148_v57 }
 0x1ac   :  { %v186_v62 = vmul.f32 0.2, %v182_v60  ;;  %vm184_vm13 = vcmp.gt.f32.partialorder %v182_v60, 0.0 }
 0x1ae   :  { %v188_v2 = vsel %vm184_vm13, %v182_v60, %v186_v62 }
 0x1af   :  { %v190_v3 = vsel %vm135_vm8, %v188_v2, -1e+30 }
 0x1b0   :  { %v196_v6 = vsel %vm195_vm10, %v190_v3, -inf }
 0x1b1   :  { %442 = vmax.xlane.f32.xlu0 %v441_v4  ;;  %197 = vmax.xlane.f32.xlu1 %v196_v6 }
 0x1b2   :  { %340 = vrot.lane.b32.xlu2 %v930_v15, %s867_s19 }
 0x1b9   :  { %567 = vmax.xlane.f32.xlu0 %v566_v10  ;;  %445 = vmax.xlane.f32.xlu1 %v444_v11 }
 0x1cd   :  { %467 = vrot.lane.b32.xlu0 %v932_v16, %s868_s20 }
 0x1d2   :  { %342 = vrot.lane.b32.xlu1 %v932_v16, %s867_s19 }
 0x1db   :  { %570 = vmax.xlane.f32.xlu2 %v569_v19 }
 0x205   :  { %v317_v20 = vpop.xlane.xlu2 %316 }
 0x206   :  { %v321_v21 = vsub.f32 %v992_v25, %v317_v20 }
 0x208   :  { %v323_v22 = vmul.f32 1.442695, %v321_v21 }
 0x20a   :  { %698 = vpow2.f32 %v323_v22 }
 0x20d   :  { %v320_v23 = vpop.xlane.xlu2 %319 }
 0x20e   :  { %v322_v24 = vsub.f32 %v1001_v33, %v320_v23 }
 0x210   :  { %v699_v27 = vpop.eup %698  ;;  %v325_v28 = vmul.f32 1.442695, %v322_v24 }
 0x211   :  { %v1045_v29 = vsel %vm134_vm5, %v699_v27, 0.0 }
 0x212   :  { %700 = vpow2.f32 %v325_v28  ;;  %v329_v30 = vsel %vm191_vm7, %v1045_v29, 0.0 }
 0x213   :  { %330 = vadd.xlane.f32.xlu2 %v329_v30 }
 0x215   :  { %v341_v61 = vpop.permute.xlu2 %340 }
 0x218   :  { %v701_v31 = vpop.eup %700 }
 0x219   :  { %v1051_v25 = vsel %vm135_vm8, %v701_v31, 0.0 }
 0x21a   :  { %v332_v32 = vsel %vm195_vm10, %v1051_v25, 0.0 }
 0x21b   :  { %333 = vadd.xlane.f32.xlu2 %v332_v32 }
 0x21c   :  { %v194_v33 = vpop.xlane.xlu0 %193 }
 0x21d   :  { %v199_v0 = vsub.f32 %v1012_v54, %v194_v33 }
 0x21f   :  { %v201_v2 = vmul.f32 1.442695, %v199_v0 }
 0x224   :  { %v443_v34 = vpop.xlane.xlu0 %442  ;;  %v198_v35 = vpop.xlane.xlu1 %197 }
 0x225   :  { %v447_v36 = vsub.f32 %v439_v63, %v443_v34  ;;  %v200_v42 = vsub.f32 %v190_v3, %v198_v35 }
 0x227   :  { %v449_v37 = vmul.f32 1.442695, %v447_v36  ;;  %v203_v48 = vmul.f32 1.442695, %v200_v42 }
 0x229   :  { %702 = vpow2.f32 %v449_v37 }
 0x22c   :  { %v568_v38 = vpop.xlane.xlu0 %567  ;;  %v446_v39 = vpop.xlane.xlu1 %445 }
 0x22d   :  { %v572_v40 = vsub.f32 %v564_v9, %v568_v38  ;;  %v448_v41 = vsub.f32 %v440_v5, %v446_v39 }
 0x22f   :  { %v703_v43 = vpop.eup %702  ;;  %v574_v44 = vmul.f32 1.442695, %v572_v40  ;;  %v451_v45 = vmul.f32 1.442695, %v448_v41 }
 0x230   :  { %v453_v46 = vsel %vm134_vm5, %v703_v43, 0.0 }
 0x231   :  { %704 = vpow2.f32 %v574_v44  ;;  %v455_v47 = vsel %vm191_vm7, %v453_v46, 0.0 }
 0x232   :  { %706 = vpow2.f32 %v451_v45  ;;  %456 = vadd.xlane.f32.xlu0 %v455_v47 }
 0x233   :  { %708 = vpow2.f32 %v203_v48 }
 0x237   :  { %v705_v49 = vpop.eup %704 }
 0x238   :  { %v707_v50 = vpop.eup %706  ;;  %v578_v51 = vsel %vm134_vm5, %v705_v49, 0.0 }
 0x239   :  { %v580_v52 = vsel %vm191_vm7, %v578_v51, 0.0  ;;  %v454_v53 = vsel %vm135_vm8, %v707_v50, 0.0  ;;  %v709_v56 = vpop.eup %708 }
 0x23a   :  { %581 = vadd.xlane.f32.xlu2 %v580_v52  ;;  %v458_v55 = vsel %vm195_vm10, %v454_v53, 0.0  ;;  %v1066_v58 = vsel %vm135_vm8, %v709_v56, 0.0 }
 0x23b   :  { %459 = vadd.xlane.f32.xlu1 %v458_v55  ;;  %v210_v59 = vsel %vm195_vm10, %v1066_v58, 0.0 }
 0x23f   :  { %v468_v57 = vpop.permute.xlu0 %467 }
 0x240   :  { %676 = vmatpush.msk.msra.mxu3 %vm223_vm1, %v468_v57 }
 0x243   :  { %211 = vadd.xlane.f32.xlu1 %v210_v59 }
 0x244   :  { %v343_v60 = vpop.permute.xlu1 %342 }
 0x245   :  { %673 = vmatpush.msk.msra.mxu2 %vm223_vm1, %v343_v60 }
 0x246   :  { %465 = vrot.lane.b32.xlu0 %v930_v15, %s868_s20 }
 0x247   :  { %368 = vmatpush.msra.mxu2 %v341_v61 }
 0x24e   :  { %592 = vrot.lane.b32.xlu0 %v932_v16, %s869_s21  ;;  %v571_v62 = vpop.xlane.xlu2 %570 }
 0x24f   :  { %v573_v63 = vsub.f32 %v1037_v18, %v571_v62 }
 0x251   :  { %v576_v1 = vmul.f32 1.442695, %v573_v63 }
 0x252   :  { %590 = vrot.lane.b32.xlu2 %v930_v15, %s869_s21 }
 0x253   :  { %710 = vpow2.f32 %v576_v1 }
 0x254   :  { %712 = vpow2.f32 %v201_v2 }
 0x259   :  { %v711_v3 = vpop.eup %710 }
 0x25a   :  { %v713_v4 = vpop.eup %712  ;;  %v579_v6 = vsel %vm135_vm8, %v711_v3, 0.0 }
 0x25b   :  { %v583_v7 = vsel %vm195_vm10, %v579_v6, 0.0  ;;  %v205_v16 = vsel %vm134_vm5, %v713_v4, 0.0  ;;  %vm659_vm5 = vcmask 257024  }
 0x25c   :  { %v207_v15 = vsel %vm191_vm7, %v205_v16, 0.0 }
 0x278   :  { %584 = vadd.xlane.f32.xlu0 %v583_v7 }
 0x27b   :  { %208 = vadd.xlane.f32.xlu2 %v207_v15 }
 0x286   :  { %v331_v8 = vpop.xlane.xlu2 %330 }
 0x287   :  { %714 = vrcp.f32 %v331_v8 }
 0x28d   :  { %v715_v54 = vpop.eup %714 }
 0x28e   :  { %v334_v9 = vpop.xlane.xlu2 %333  ;;  %v337_v5 = vmul.f32 %v715_v54, %v1045_v29 }
 0x28f   :  { %716 = vrcp.f32 %v334_v9 }
 0x290   :  { %674 = vmatmul.msk.f32.vlgmr.msra.gmra.mxu2 %vm191_vm7, %v337_v5 }
 0x295   :  { %v717_v26 = vpop.eup %716 }
 0x296   :  { %v338_v10 = vmul.f32 %v717_v26, %v1051_v25 }
 0x298   :  { %675 = vmatmul.msk.f32.gmra.mxu2 %vm191_vm7, %v338_v10 }
 0x2a5   :  { %v457_v17 = vpop.xlane.xlu0 %456 }
 0x2a6   :  { %718 = vrcp.f32 %v457_v17 }
 0x2ac   :  { %v719_v12 = vpop.eup %718 }
 0x2ad   :  { %v582_v13 = vpop.xlane.xlu2 %581  ;;  %v463_v18 = vmul.f32 %v719_v12, %v453_v46 }
 0x2ae   :  { %v460_v11 = vpop.xlane.xlu1 %459 }
 0x2af   :  { %720 = vrcp.f32 %v460_v11 }
 0x2b0   :  { %722 = vrcp.f32 %v582_v13 }
 0x2b5   :  { %v721_v19 = vpop.eup %720  ;;  %v591_v23 = vpop.permute.xlu2 %590 }
 0x2b6   :  { %v723_v20 = vpop.eup %722  ;;  %v464_v22 = vmul.f32 %v721_v19, %v454_v53  ;;  %v212_v30 = vpop.xlane.xlu1 %211 }
 0x2b7   :  { %v588_v24 = vmul.f32 %v723_v20, %v578_v51 }
 0x2b8   :  { %v466_v14 = vpop.permute.xlu0 %465 }
 0x2b9   :  { %493 = vmatpush.msra.mxu3 %v466_v14 }
 0x2ba   :  { %677 = vmatmul.msk.f32.vlgmr.msra.gmra.mxu3 %vm191_vm7, %v463_v18 }
 0x2c0   :  { %v593_v21 = vpop.permute.xlu0 %592 }
 0x2c1   :  { %679 = vmatpush.msk.msrb.mxu0 %vm223_vm1, %v593_v21  ;;  %vm654_vm1 = vcmask 195584  }
 0x2c2   :  { %678 = vmatmul.msk.f32.gmra.mxu3 %vm191_vm7, %v464_v22 }
 0x2c3   :  { %618 = vmatpush.msrb.mxu0 %v591_v23 }
 0x2c4   :  { %680 = vmatmul.msk.f32.vlgmr.msrb.gmra.mxu0 %vm191_vm7, %v588_v24 }
 0x2eb   :  { %v585_v27 = vpop.xlane.xlu0 %584 }
 0x2ec   :  { %724 = vrcp.f32 %v585_v27 }
 0x2ee   :  { %v209_v28 = vpop.xlane.xlu2 %208 }
 0x2ef   :  { %726 = vrcp.f32 %v209_v28 }
 0x2f0   :  { %728 = vrcp.f32 %v212_v30 }
 0x2f2   :  { %v725_v29 = vpop.eup %724 }
 0x2f3   :  { %v589_v31 = vmul.f32 %v725_v29, %v579_v6 }
 0x2f5   :  { %v727_v25 = vpop.eup %726  ;;  %681 = vmatmul.msk.f32.gmra.mxu0 %vm191_vm7, %v589_v31 }
 0x2f6   :  { %v215_v32 = vmul.f32 %v727_v25, %v205_v16  ;;  %v729_v33 = vpop.eup %728 }
 0x2f7   :  { %v216_v34 = vmul.f32 %v729_v33, %v1066_v58 }
 0x2f8   :  { %671 = vmatmul.msk.f32.vlgmr.msrb.gmra.mxu1 %vm191_vm7, %v215_v32 }
 0x300   :  { %672 = vmatmul.msk.f32.gmra.mxu1 %vm191_vm7, %v216_v34 }
 0x313   :  { %v370_v35 = vpop.f32.mrf.mxu2 }
 0x314   :  { %628 = vrot.lane.b32.xlu1 %v370_v35, %s858_s27 }
 0x31b   :  { %v373_v36 = vpop.f32.mrf.mxu2 }
 0x31c   :  { %630 = vrot.lane.b32.xlu0 %v373_v36, %s858_s27 }
 0x33d   :  { %v495_v37 = vpop.f32.mrf.mxu3 }
 0x33e   :  { %636 = vrot.lane.b32.xlu2 %v495_v37, %s866_s4 }
 0x341   :  { %v620_v38 = vpop.f32.mrf.mxu0 }
 0x342   :  { %644 = vrot.lane.b32.xlu0 %v620_v38, %s865_s2 }
 0x345   :  { %v498_v39 = vpop.f32.mrf.mxu3 }
 0x346   :  { %638 = vrot.lane.b32.xlu1 %v498_v39, %s866_s4 }
 0x372   :  { %v623_v40 = vpop.f32.mrf.mxu0 }
 0x373   :  { %646 = vrot.lane.b32.xlu1 %v623_v40, %s865_s2 }
 0x375   :  { %v244_v44 = vpop.f32.mrf.mxu1 }
 0x37d   :  { %v247_v50 = vpop.f32.mrf.mxu1 }
 0x386   :  { %v629_v42 = vpop.permute.xlu1 %628 }
 0x387   :  { %v650_v45 = vsel %vm141_vm2, %v244_v44, %v629_v42 }
 0x38e   :  { %v631_v41 = vpop.permute.xlu0 %630 }
 0x38f   :  { %v651_v51 = vsel %vm141_vm2, %v247_v50, %v631_v41 }
 0x398   :  { %v637_v43 = vpop.permute.xlu2 %636 }
 0x399   :  { %v652_v46 = vsel %vm98_vm0, %v650_v45, %v637_v43 }
 0x3b4   :  { %v645_v47 = vpop.permute.xlu0 %644 }
 0x3b5   :  { %v655_v48 = vsel %vm654_vm1, %v652_v46, %v645_v47 }
 0x3b6   :  { %658 = vst.msk [vmem:[%s1119_s5] sm:$0xff] %vm657_vm4, %v655_v48 }
 0x3b8   :  { %v639_v49 = vpop.permute.xlu1 %638 }
 0x3b9   :  { %v653_v52 = vsel %vm98_vm0, %v651_v51, %v639_v49 }
 0x3e5   :  { %v647_v53 = vpop.permute.xlu1 %646 }
 0x3e6   :  { %v656_v55 = vsel %vm654_vm1, %v653_v52, %v647_v53 }
 0x3e7   :  { %660 = vst.msk [vmem:[%s1119_s5 + $0x8] sm:$0xf] %vm659_vm5, %v656_v55 }
 0x3e8   :  { %665 = vsyncpa [#allocation3], 1 }
 0x3e9   :  { %666 = vsyncpa [#allocation5], 1 }
 0x3ea   :  { %667 = vsyncpa [#allocation8], 1 }

// kernel: _lambda_.3
= control target key start
LH: loop header
LB: loop body
LE: loop exit
PB: predicated region body
PF: predicated region fallthrough
CT: control target
= control target key end

     0   :  { %10 = vsyncpa [#allocation3], 0  ;;  %s952_s0 = inlined_call_operand.vmem [shape: f32[12,32], index: 0, kind: input, shape index: {}]   ;;  %s953_s1 = inlined_call_operand.vmem [shape: f32[32,32], index: 1, kind: input, shape index: {}]   ;;  %s954_s2 = inlined_call_operand.hbm [shape: s8[12,12], index: 2, kind: input, shape index: {}]   ;;  %s955_s3 = inlined_call_operand.hbm [shape: f32[4,8], index: 3, kind: input, shape index: {}]   ;;  %s956_s4 = inlined_call_operand.vmem [shape: f32[4,8], index: 4, kind: input, shape index: {}]   ;;  %s957_s5 = inlined_call_operand.vmem [shape: f32[12,8], index: 5, kind: output, shape index: {}]  }
   0x1   :  { %s20_s20 = sshll.u32 %s954_s2, 4  ;;  %s21_s20 = int_to_ptr.hbm [resolvable:$true] %s20_s20 }
   0x2   :  { %11 = vsyncpa [#allocation5], 0  ;;  %s708_s21 = smov [#allocation2]   ;;  %s34_s25 = sshll.u32 %s955_s3, 4  ;;  %s35_s25 = int_to_ptr.hbm [resolvable:$true] %s34_s25 }
   0x3   :  { %s22_s22 = sshll.u32 %s708_s21, 4  ;;  %s709_s26 = smov 32   ;;  %s23_s22 = int_to_ptr.vmem [resolvable:$true] %s22_s22 }
   0x4   :  { %s710_s27 = smov 2   ;;  %s711_s28 = smov [#allocation4]  }
   0x5   :  { %28 = dma.hbm_to_vmem [thread:$0]  %s21_s20, 64, %s23_s22, [#allocation3], %s709_s26, %s709_s26, %s710_s27  }
   0x6   :  { %s36_s29 = sshll.u32 %s711_s28, 4  ;;  %s37_s29 = int_to_ptr.vmem [resolvable:$true] %s36_s29 }
   0x7   :  { %39 = dma.hbm_to_vmem [thread:$0]  %s35_s25, 64, %s37_s29, [#allocation5]  }
   0x8   :  { %704 = dma.done.wait [#allocation3], 64  }
   0x9   :  { %705 = vsyncadd [#allocation3], 4294967232 }
   0xa   :  { %706 = dma.done.wait [#allocation5], 64  }
   0xb   :  { %707 = vsyncadd [#allocation5], 4294967232  ;;  %v55_v0 = vld [vmem:[%s953_s1 + $0x18] sm:$0xff]  ;;  %v54_v1 = vld [vmem:[%s953_s1 + $0x10] sm:$0xff]  ;;  %s712_s13 = smov 16   ;;  %s713_s14 = smov 8  }
   0xc   :  { %75 = vmatpush.msra.mxu0 %v55_v0  ;;  %v763_v2 = vld [vmem:[%s956_s4] sm:$0xf]  ;;  %v53_v3 = vld [vmem:[%s953_s1 + $0x8] sm:$0xff]  ;;  %v770_v6 = vld [vmem:[#allocation4] sm:$0xf]  ;;  %vm56_vm0 = vcmask 261120  }
   0xd   :  { %v324_v4 = vperm.slane %v763_v2, 2  ;;  %v196_v5 = vperm.slane %v763_v2, 1  ;;  %v52_v7 = vld [vmem:[%s953_s1] sm:$0xff]  ;;  %v303_v8 = vperm.slane %v770_v6, 2  ;;  %v449_v10 = vperm.slane %v763_v2, 3  ;;  %s714_s1 = smov 24  }
   0xe   :  { %76 = vmatpush.msra.mxu0 %v54_v1  ;;  %v50_v9 = vld [vmem:[%s952_s0] sm:$0xff]  ;;  %v175_v11 = vperm.slane %v770_v6, 1  ;;  %v428_v12 = vperm.slane %v770_v6, 3  ;;  %v51_v13 = vld [vmem:[%s952_s0 + $0x8] sm:$0xf]  ;;  %s715_s18 = smov 112  }
   0xf   :  { %326 = vrot.lane.b32.xlu1 %v324_v4, %s712_s13  ;;  %198 = vrot.lane.b32.xlu0 %v196_v5, %s713_s14  ;;  %s716_s19 = smov 120   ;;  %s717_s0 = smov 104   ;;  %v107_v31 = vperm.slane %v763_v2, 0  ;;  %vm99_vm1 = vcmask 64512   ;;  %vm103_vm2 = vcmask 60416   ;;  %v96_v58 = vperm.slane %v770_v6, 0 }
  0x10   :  { %77 = vmatpush.msra.mxu0 %v53_v3  ;;  %305 = vrot.lane.b32.xlu2 %v303_v8, %s712_s13  ;;  %vm123_vm3 = vcmask 130112   ;;  %vm153_vm6 = vcmask 93184   ;;  %vm149_vm9 = vcmask 97280  }
  0x12   :  { %78 = vmatpush.msra.mxu0 %v52_v7 }
  0x13   :  { %598 = vmatmul.msk.f32.vlgmr.msra.gmra.mxu0 %vm56_vm0, %v50_v9  ;;  %v118_v9 = vlaneseq }
  0x17   :  { %451 = vrot.lane.b32.xlu1 %v449_v10, %s714_s1  ;;  %177 = vrot.lane.b32.xlu0 %v175_v11, %s713_s14  ;;  %v119_v10 = vand.u32 127, %v118_v9 }
  0x18   :  { %430 = vrot.lane.b32.xlu2 %v428_v12, %s714_s1 }
  0x19   :  { %v121_v12 = vadd.s32 4294967288, %v119_v10 }
  0x1b   :  { %599 = vmatmul.msk.f32.gmra.mxu0 %vm56_vm0, %v51_v13  ;;  %vm277_vm0 = vcmask 1043456  }
  0x6a   :  { %v306_v15 = vpop.permute.xlu2 %305 }
  0x72   :  { %v431_v28 = vpop.permute.xlu2 %430 }
  0x81   :  { %v199_v14 = vpop.permute.xlu0 %198  ;;  %v327_v16 = vpop.permute.xlu1 %326 }
  0x89   :  { %v178_v21 = vpop.permute.xlu0 %177  ;;  %v452_v25 = vpop.permute.xlu1 %451 }
  0x90   :  { %v785_v17 = vpop.f32.mrf.mxu0 }
  0x91   :  { %v329_v18 = vmul.f32 %v327_v16, %v785_v17  ;;  %v308_v19 = vmul.f32 %v306_v15, %v785_v17  ;;  %v201_v20 = vmul.f32 %v199_v14, %v785_v17  ;;  %v180_v24 = vmul.f32 %v178_v21, %v785_v17 }
  0x92   :  { %v454_v27 = vmul.f32 %v452_v25, %v785_v17  ;;  %v433_v30 = vmul.f32 %v431_v28, %v785_v17  ;;  %v108_v32 = vmul.f32 %v107_v31, %v785_v17  ;;  %v97_v59 = vmul.f32 %v96_v58, %v785_v17 }
  0x93   :  { %333 = vrot.lane.b32.xlu1 %v329_v18, %s715_s18  ;;  %312 = vrot.lane.b32.xlu2 %v308_v19, %s715_s18 }
  0x94   :  { %205 = vrot.lane.b32.xlu0 %v201_v20, %s716_s19  ;;  %v110_v33 = vsel %vm99_vm1, %v108_v32, 0.0  ;;  %v100_v61 = vsel %vm99_vm1, %v97_v59, 0.0 }
  0x98   :  { %v793_v22 = vpop.f32.mrf.mxu0 }
  0x99   :  { %v202_v23 = vmul.f32 %v199_v14, %v793_v22  ;;  %v455_v26 = vmul.f32 %v452_v25, %v793_v22  ;;  %v309_v29 = vmul.f32 %v306_v15, %v793_v22  ;;  %v181_v34 = vmul.f32 %v178_v21, %v793_v22  ;;  %v87_v14 = vld [vmem:[#allocation2 + $0x2] sm:$0x1] }
  0x9a   :  { %v330_v35 = vmul.f32 %v327_v16, %v793_v22  ;;  %v434_v36 = vmul.f32 %v431_v28, %v793_v22  ;;  %v109_v51 = vmul.f32 %v107_v31, %v793_v22  ;;  %v98_v63 = vmul.f32 %v96_v58, %v793_v22 }
  0x9b   :  { %207 = vrot.lane.b32.xlu1 %v202_v23, %s716_s19  ;;  %v89_v16 = vunpack.c.0.s8 %v87_v14 }
  0x9c   :  { %184 = vrot.lane.b32.xlu0 %v180_v24, %s716_s19  ;;  %v113_v52 = vsel %vm103_vm2, %v109_v51, 0.0  ;;  %v104_v2 = vsel %vm103_vm2, %v98_v63, 0.0 }
  0x9d   :  { %v837_v20 = vcvt.s32.f32 %v89_v16 }
  0x9f   :  { %vm93_vm4 = vcmp.gt.f32.partialorder %v837_v20, 0.0 }
  0xa3   :  { %460 = vrot.lane.b32.xlu1 %v455_v26, %s717_s0  ;;  %v86_v26 = vld [vmem:[#allocation2] sm:$0x3] }
  0xa4   :  { %458 = vrot.lane.b32.xlu0 %v454_v27, %s717_s0 }
  0xab   :  { %314 = vrot.lane.b32.xlu1 %v309_v29, %s715_s18 }
  0xac   :  { %437 = vrot.lane.b32.xlu0 %v433_v30, %s717_s0  ;;  %v88_v30 = vunpack.c.0.s8 %v86_v26 }
  0xbc   :  { %111 = vadd.xlane.f32.xlu2 %v110_v33 }
  0xd4   :  { %186 = vrot.lane.b32.xlu2 %v181_v34, %s716_s19 }
  0xdc   :  { %335 = vrot.lane.b32.xlu2 %v330_v35, %s715_s18 }
  0xe4   :  { %439 = vrot.lane.b32.xlu2 %v434_v36, %s717_s0 }
  0xed   :  { %v313_v37 = vpop.permute.xlu2 %312 }
  0xee   :  { %v318_v38 = vsel %vm99_vm1, %v313_v37, 0.0 }
  0xef   :  { %319 = vadd.xlane.f32.xlu1 %v318_v38 }
 0x105   :  { %v334_v39 = vpop.permute.xlu1 %333 }
 0x106   :  { %v206_v40 = vpop.permute.xlu0 %205  ;;  %v339_v45 = vsel %vm99_vm1, %v334_v39, 0.0 }
 0x107   :  { %v211_v41 = vsel %vm99_vm1, %v206_v40, 0.0  ;;  %v848_v40 = vcvt.s32.f32 %v88_v30 }
 0x108   :  { %212 = vadd.xlane.f32.xlu0 %v211_v41 }
 0x109   :  { %vm92_vm8 = vcmp.gt.f32.partialorder %v848_v40, 0.0 }
 0x10d   :  { %v208_v42 = vpop.permute.xlu1 %207 }
 0x10e   :  { %v185_v43 = vpop.permute.xlu0 %184  ;;  %v214_v44 = vsel %vm103_vm2, %v208_v42, 0.0 }
 0x10f   :  { %215 = vadd.xlane.f32.xlu1 %v214_v44  ;;  %v190_v46 = vsel %vm99_vm1, %v185_v43, 0.0 }
 0x110   :  { %340 = vadd.xlane.f32.xlu0 %v339_v45  ;;  %191 = vadd.xlane.f32.xlu2 %v190_v46 }
 0x115   :  { %v461_v47 = vpop.permute.xlu1 %460 }
 0x116   :  { %v459_v48 = vpop.permute.xlu0 %458  ;;  %v467_v49 = vsel %vm103_vm2, %v461_v47, 0.0 }
 0x117   :  { %v464_v50 = vsel %vm99_vm1, %v459_v48, 0.0 }
 0x118   :  { %468 = vadd.xlane.f32.xlu0 %v467_v49  ;;  %465 = vadd.xlane.f32.xlu2 %v464_v50 }
 0x11d   :  { %v315_v53 = vpop.permute.xlu1 %314 }
 0x11e   :  { %v321_v54 = vsel %vm103_vm2, %v315_v53, 0.0  ;;  %v438_v0 = vpop.permute.xlu0 %437 }
 0x11f   :  { %v443_v1 = vsel %vm99_vm1, %v438_v0, 0.0 }
 0x120   :  { %114 = vadd.xlane.f32.xlu0 %v113_v52 }
 0x128   :  { %322 = vadd.xlane.f32.xlu0 %v321_v54 }
 0x12f   :  { %v112_v55 = vpop.xlane.xlu2 %111 }
 0x130   :  { %v120_v31 = vperm.slane %v112_v55, %v119_v10 }
 0x137   :  { %v187_v56 = vpop.permute.xlu2 %186 }
 0x138   :  { %v193_v57 = vsel %vm103_vm2, %v187_v56, 0.0 }
 0x139   :  { %194 = vadd.xlane.f32.xlu2 %v193_v57 }
 0x13f   :  { %v336_v60 = vpop.permute.xlu2 %335 }
 0x140   :  { %v342_v62 = vsel %vm103_vm2, %v336_v60, 0.0 }
 0x141   :  { %101 = vadd.xlane.f32.xlu2 %v100_v61  ;;  %343 = vadd.xlane.f32.xlu1 %v342_v62 }
 0x147   :  { %v440_v3 = vpop.permute.xlu2 %439 }
 0x148   :  { %v446_v4 = vsel %vm103_vm2, %v440_v3, 0.0 }
 0x149   :  { %444 = vadd.xlane.f32.xlu1 %v443_v1  ;;  %105 = vadd.xlane.f32.xlu2 %v104_v2 }
 0x151   :  { %447 = vadd.xlane.f32.xlu1 %v446_v4 }
 0x162   :  { %v320_v8 = vpop.xlane.xlu1 %319 }
 0x16a   :  { %268 = vrot.lane.b32.xlu1 %v793_v22, %s716_s19 }
 0x17b   :  { %v213_v5 = vpop.xlane.xlu0 %212 }
 0x17c   :  { %v219_v19 = vperm.slane %v213_v5, %v119_v10 }
 0x182   :  { %v216_v15 = vpop.xlane.xlu1 %215 }
 0x183   :  { %v341_v6 = vpop.xlane.xlu0 %340  ;;  %v192_v7 = vpop.xlane.xlu2 %191  ;;  %v220_v18 = vperm.slane %v216_v15, %v121_v12 }
 0x184   :  { %v347_v37 = vperm.slane %v341_v6, %v119_v10 }
 0x185   :  { %v221_v21 = vsel %vm123_vm3, %v220_v18, %v219_v19 }
 0x186   :  { %v230_v52 = vadd.f32 %v221_v21, %v192_v7 }
 0x188   :  { %v234_v1 = vmul.f32 0.2, %v230_v52  ;;  %vm232_vm14 = vcmp.gt.f32.partialorder %v230_v52, 0.0 }
 0x18b   :  { %v469_v11 = vpop.xlane.xlu0 %468  ;;  %v466_v13 = vpop.xlane.xlu2 %465 }
 0x18c   :  { %v473_v44 = vperm.slane %v469_v11, %v121_v12  ;;  %v472_v45 = vperm.slane %v466_v13, %v119_v10  ;;  %v236_v11 = vsel %vm232_vm14, %v230_v52, %v234_v1 }
 0x18d   :  { %v238_v14 = vsel %vm92_vm8, %v236_v11, -1e+30 }
 0x18e   :  { %v474_v54 = vsel %vm123_vm3, %v473_v44, %v472_v45  ;;  %v240_v19 = vsel %vm149_vm9, %v238_v14, -inf }
 0x193   :  { %v115_v24 = vpop.xlane.xlu0 %114 }
 0x194   :  { %v122_v28 = vperm.slane %v115_v24, %v121_v12 }
 0x196   :  { %v124_v36 = vsel %vm123_vm3, %v122_v28, %v120_v31 }
 0x19b   :  { %v323_v41 = vpop.xlane.xlu0 %322 }
 0x1ac   :  { %v195_v23 = vpop.xlane.xlu2 %194 }
 0x1ad   :  { %v231_v25 = vadd.f32 %v221_v21, %v195_v23 }
 0x1af   :  { %v235_v27 = vmul.f32 0.2, %v231_v25  ;;  %vm233_vm5 = vcmp.gt.f32.partialorder %v231_v25, 0.0 }
 0x1b1   :  { %v237_v29 = vsel %vm233_vm5, %v231_v25, %v235_v27 }
 0x1b2   :  { %v843_v32 = vsel %vm93_vm4, %v237_v29, -1e+30 }
 0x1b3   :  { %v243_v33 = vsel %vm153_vm6, %v843_v32, -inf }
 0x1b4   :  { %v344_v34 = vpop.xlane.xlu1 %343  ;;  %v102_v35 = vpop.xlane.xlu2 %101  ;;  %244 = vmax.xlane.f32.xlu0 %v243_v33 }
 0x1b5   :  { %v348_v38 = vperm.slane %v344_v34, %v121_v12  ;;  %v139_v39 = vadd.f32 %v124_v36, %v102_v35 }
 0x1b7   :  { %v349_v42 = vsel %vm123_vm3, %v348_v38, %v347_v37  ;;  %v143_v43 = vmul.f32 0.2, %v139_v39  ;;  %vm141_vm7 = vcmp.gt.f32.partialorder %v139_v39, 0.0 }
 0x1b8   :  { %v358_v46 = vadd.f32 %v349_v42, %v320_v8  ;;  %v359_v47 = vadd.f32 %v349_v42, %v323_v41 }
 0x1b9   :  { %v145_v48 = vsel %vm141_vm7, %v139_v39, %v143_v43 }
 0x1ba   :  { %v147_v49 = vsel %vm92_vm8, %v145_v48, -1e+30  ;;  %vm360_vm10 = vcmp.gt.f32.partialorder %v358_v46, 0.0  ;;  %v362_v50 = vmul.f32 0.2, %v358_v46  ;;  %vm361_vm11 = vcmp.gt.f32.partialorder %v359_v47, 0.0 }
 0x1bb   :  { %v150_v51 = vsel %vm149_vm9, %v147_v49, -inf  ;;  %v363_v57 = vmul.f32 0.2, %v359_v47 }
 0x1bc   :  { %v445_v53 = vpop.xlane.xlu1 %444  ;;  %151 = vmax.xlane.f32.xlu1 %v150_v51  ;;  %v106_v55 = vpop.xlane.xlu2 %105  ;;  %v364_v56 = vsel %vm360_vm10, %v358_v46, %v362_v50 }
 0x1bd   :  { %v483_v58 = vadd.f32 %v474_v54, %v445_v53  ;;  %v140_v59 = vadd.f32 %v124_v36, %v106_v55  ;;  %v366_v60 = vsel %vm92_vm8, %v364_v56, -1e+30  ;;  %v365_v0 = vsel %vm361_vm11, %v359_v47, %v363_v57 }
 0x1be   :  { %v368_v61 = vsel %vm149_vm9, %v366_v60, -inf  ;;  %v870_v8 = vsel %vm93_vm4, %v365_v0, -1e+30 }
 0x1bf   :  { %v487_v62 = vmul.f32 0.2, %v483_v58  ;;  %v144_v63 = vmul.f32 0.2, %v140_v59  ;;  %369 = vmax.xlane.f32.xlu2 %v368_v61  ;;  %vm485_vm12 = vcmp.gt.f32.partialorder %v483_v58, 0.0  ;;  %vm142_vm13 = vcmp.gt.f32.partialorder %v140_v59, 0.0 }
 0x1c0   :  { %v371_v12 = vsel %vm153_vm6, %v870_v8, -inf }
 0x1c1   :  { %v489_v2 = vsel %vm485_vm12, %v483_v58, %v487_v62  ;;  %v146_v3 = vsel %vm142_vm13, %v140_v59, %v144_v63 }
 0x1c2   :  { %v491_v4 = vsel %vm92_vm8, %v489_v2, -1e+30  ;;  %v863_v5 = vsel %vm93_vm4, %v146_v3, -1e+30 }
 0x1c3   :  { %v493_v6 = vsel %vm149_vm9, %v491_v4, -inf  ;;  %v154_v7 = vsel %vm153_vm6, %v863_v5, -inf }
 0x1c4   :  { %v448_v9 = vpop.xlane.xlu1 %447  ;;  %494 = vmax.xlane.f32.xlu0 %v493_v6  ;;  %155 = vmax.xlane.f32.xlu1 %v154_v7 }
 0x1c5   :  { %v484_v10 = vadd.f32 %v474_v54, %v448_v9 }
 0x1c7   :  { %v488_v13 = vmul.f32 0.2, %v484_v10  ;;  %372 = vmax.xlane.f32.xlu2 %v371_v12  ;;  %vm486_vm15 = vcmp.gt.f32.partialorder %v484_v10, 0.0 }
 0x1c9   :  { %v490_v15 = vsel %vm486_vm15, %v484_v10, %v488_v13 }
 0x1ca   :  { %v492_v16 = vsel %vm93_vm4, %v490_v15, -1e+30 }
 0x1cb   :  { %v496_v18 = vsel %vm153_vm6, %v492_v16, -inf }
 0x1cc   :  { %497 = vmax.xlane.f32.xlu0 %v496_v18  ;;  %241 = vmax.xlane.f32.xlu1 %v240_v19 }
 0x1dc   :  { %v269_v21 = vpop.permute.xlu1 %268 }
 0x1dd   :  { %600 = vmatpush.msk.msra.mxu1 %vm277_vm0, %v269_v21  ;;  %612 = vmatpush.msk.msra.mxu2 %vm277_vm0, %v269_v21 }
 0x1e5   :  { %394 = vrot.lane.b32.xlu1 %v793_v22, %s715_s18 }
 0x1ed   :  { %519 = vrot.lane.b32.xlu1 %v793_v22, %s717_s0 }
 0x227   :  { %v245_v23 = vpop.xlane.xlu0 %244 }
 0x228   :  { %v247_v24 = vsub.f32 %v843_v32, %v245_v23 }
 0x22a   :  { %v250_v25 = vmul.f32 1.442695, %v247_v24 }
 0x22c   :  { %624 = vpow2.f32 %v250_v25 }
 0x22f   :  { %v152_v26 = vpop.xlane.xlu1 %151 }
 0x230   :  { %v157_v27 = vsub.f32 %v147_v49, %v152_v26 }
 0x232   :  { %v625_v28 = vpop.eup %624  ;;  %v159_v29 = vmul.f32 1.442695, %v157_v27  ;;  %v370_v30 = vpop.xlane.xlu2 %369 }
 0x233   :  { %v374_v31 = vsub.f32 %v366_v60, %v370_v30  ;;  %v889_v33 = vsel %vm93_vm4, %v625_v28, 0.0 }
 0x234   :  { %626 = vpow2.f32 %v159_v29  ;;  %v257_v34 = vsel %vm153_vm6, %v889_v33, 0.0 }
 0x235   :  { %v376_v35 = vmul.f32 1.442695, %v374_v31  ;;  %258 = vadd.xlane.f32.xlu2 %v257_v34 }
 0x237   :  { %v495_v36 = vpop.xlane.xlu0 %494  ;;  %v156_v32 = vpop.xlane.xlu1 %155  ;;  %628 = vpow2.f32 %v376_v35 }
 0x238   :  { %v499_v37 = vsub.f32 %v491_v4, %v495_v36  ;;  %v158_v1 = vsub.f32 %v863_v5, %v156_v32 }
 0x23a   :  { %v627_v38 = vpop.eup %626  ;;  %v501_v41 = vmul.f32 1.442695, %v499_v37  ;;  %v373_v40 = vpop.xlane.xlu2 %372  ;;  %v161_v3 = vmul.f32 1.442695, %v158_v1 }
 0x23b   :  { %v895_v39 = vsel %vm92_vm8, %v627_v38, 0.0  ;;  %v375_v63 = vsub.f32 %v870_v8, %v373_v40 }
 0x23c   :  { %v165_v42 = vsel %vm149_vm9, %v895_v39, 0.0  ;;  %630 = vpow2.f32 %v501_v41 }
 0x23d   :  { %166 = vadd.xlane.f32.xlu2 %v165_v42  ;;  %v629_v43 = vpop.eup %628  ;;  %v378_v0 = vmul.f32 1.442695, %v375_v63 }
 0x23e   :  { %v901_v48 = vsel %vm92_vm8, %v629_v43, 0.0 }
 0x23f   :  { %v498_v44 = vpop.xlane.xlu0 %497  ;;  %v242_v45 = vpop.xlane.xlu1 %241  ;;  %v382_v51 = vsel %vm149_vm9, %v901_v48, 0.0 }
 0x240   :  { %v500_v46 = vsub.f32 %v492_v16, %v498_v44  ;;  %v246_v47 = vsub.f32 %v238_v14, %v242_v45 }
 0x242   :  { %v503_v49 = vmul.f32 1.442695, %v500_v46  ;;  %v248_v50 = vmul.f32 1.442695, %v246_v47  ;;  %v631_v52 = vpop.eup %630 }
 0x243   :  { %v505_v53 = vsel %vm92_vm8, %v631_v52, 0.0 }
 0x244   :  { %632 = vpow2.f32 %v503_v49  ;;  %v507_v59 = vsel %vm149_vm9, %v505_v53, 0.0 }
 0x245   :  { %634 = vpow2.f32 %v248_v50  ;;  %383 = vadd.xlane.f32.xlu2 %v382_v51 }
 0x246   :  { %636 = vpow2.f32 %v378_v0 }
 0x247   :  { %638 = vpow2.f32 %v161_v3 }
 0x24a   :  { %v633_v54 = vpop.eup %632 }
 0x24b   :  { %v635_v55 = vpop.eup %634  ;;  %v506_v56 = vsel %vm93_vm4, %v633_v54, 0.0 }
 0x24c   :  { %v510_v57 = vsel %vm153_vm6, %v506_v56, 0.0  ;;  %v252_v58 = vsel %vm92_vm8, %v635_v55, 0.0  ;;  %v637_v2 = vpop.eup %636 }
 0x24d   :  { %511 = vadd.xlane.f32.xlu1 %v510_v57  ;;  %v254_v60 = vsel %vm149_vm9, %v252_v58, 0.0  ;;  %508 = vadd.xlane.f32.xlu2 %v507_v59  ;;  %v381_v4 = vsel %vm93_vm4, %v637_v2, 0.0  ;;  %v639_v7 = vpop.eup %638 }
 0x24e   :  { %255 = vadd.xlane.f32.xlu0 %v254_v60  ;;  %v385_v6 = vsel %vm153_vm6, %v381_v4, 0.0  ;;  %v164_v9 = vsel %vm93_vm4, %v639_v7, 0.0 }
 0x24f   :  { %v168_v10 = vsel %vm153_vm6, %v164_v9, 0.0 }
 0x257   :  { %v395_v61 = vpop.permute.xlu1 %394 }
 0x25f   :  { %v520_v62 = vpop.permute.xlu1 %519 }
 0x260   :  { %606 = vmatpush.msk.msra.mxu3 %vm277_vm0, %v520_v62 }
 0x262   :  { %266 = vrot.lane.b32.xlu0 %v785_v17, %s716_s19 }
 0x265   :  { %392 = vrot.lane.b32.xlu2 %v785_v17, %s715_s18 }
 0x26d   :  { %517 = vrot.lane.b32.xlu2 %v785_v17, %s717_s0 }
 0x28c   :  { %386 = vadd.xlane.f32.xlu0 %v385_v6 }
 0x296   :  { %169 = vadd.xlane.f32.xlu2 %v168_v10 }
 0x2a8   :  { %v259_v8 = vpop.xlane.xlu2 %258 }
 0x2b0   :  { %v167_v11 = vpop.xlane.xlu2 %166 }
 0x2b8   :  { %v384_v12 = vpop.xlane.xlu2 %383 }
 0x2c0   :  { %v509_v5 = vpop.xlane.xlu2 %508  ;;  %v512_v15 = vpop.xlane.xlu1 %511 }
 0x2c1   :  { %640 = vrcp.f32 %v509_v5  ;;  %v256_v13 = vpop.xlane.xlu0 %255 }
 0x2c2   :  { %642 = vrcp.f32 %v259_v8 }
 0x2c3   :  { %644 = vrcp.f32 %v256_v13 }
 0x2c4   :  { %646 = vrcp.f32 %v512_v15 }
 0x2c5   :  { %648 = vrcp.f32 %v167_v11 }
 0x2c6   :  { %650 = vrcp.f32 %v384_v12 }
 0x2c7   :  { %v641_v16 = vpop.eup %640 }
 0x2c8   :  { %v393_v14 = vpop.permute.xlu2 %392  ;;  %v643_v18 = vpop.eup %642  ;;  %v515_v21 = vmul.f32 %v641_v16, %v505_v53 }
 0x2c9   :  { %v645_v20 = vpop.eup %644  ;;  %v263_v25 = vmul.f32 %v643_v18, %v889_v33 }
 0x2ca   :  { %v262_v24 = vmul.f32 %v645_v20, %v252_v58  ;;  %v647_v26 = vpop.eup %646 }
 0x2cb   :  { %v649_v27 = vpop.eup %648  ;;  %v516_v28 = vmul.f32 %v647_v26, %v506_v56 }
 0x2cc   :  { %v651_v29 = vpop.eup %650  ;;  %v173_v31 = vmul.f32 %v649_v27, %v895_v39 }
 0x2cd   :  { %v390_v30 = vmul.f32 %v651_v29, %v901_v48 }
 0x2d0   :  { %v518_v19 = vpop.permute.xlu2 %517 }
 0x2d1   :  { %545 = vmatpush.msra.mxu3 %v518_v19 }
 0x2d2   :  { %607 = vmatmul.msk.f32.vlgmr.msra.gmra.mxu3 %vm149_vm9, %v515_v21 }
 0x2d4   :  { %v267_v23 = vpop.permute.xlu0 %266 }
 0x2d5   :  { %295 = vmatpush.msra.mxu1 %v267_v23  ;;  %613 = vmatpush.msra.mxu2 %v267_v23 }
 0x2d6   :  { %601 = vmatmul.msk.f32.vlgmr.msra.gmra.mxu1 %vm149_vm9, %v262_v24  ;;  %602 = vmatmul.msk.f32.vlgmr.msra.gmra.mxu2 %vm149_vm9, %v263_v25 }
 0x2d7   :  { %603 = vmatpush.msk.msrb.mxu2 %vm277_vm0, %v395_v61  ;;  %609 = vmatpush.msk.msrb.mxu1 %vm277_vm0, %v793_v22 }
 0x2d9   :  { %420 = vmatpush.msrb.mxu2 %v393_v14  ;;  %576 = vmatpush.msrb.mxu1 %v785_v17 }
 0x2da   :  { %608 = vmatmul.msk.f32.gmra.mxu3 %vm149_vm9, %v516_v28 }
 0x2de   :  { %604 = vmatmul.msk.f32.vlgmr.msrb.gmra.mxu2 %vm149_vm9, %v390_v30  ;;  %610 = vmatmul.msk.f32.vlgmr.msrb.gmra.mxu1 %vm149_vm9, %v173_v31 }
 0x2ff   :  { %v387_v33 = vpop.xlane.xlu0 %386 }
 0x300   :  { %652 = vrcp.f32 %v387_v33 }
 0x306   :  { %v653_v34 = vpop.eup %652 }
 0x307   :  { %v391_v22 = vmul.f32 %v653_v34, %v381_v4 }
 0x309   :  { %605 = vmatmul.msk.f32.gmra.mxu2 %vm149_vm9, %v391_v22  ;;  %v170_v35 = vpop.xlane.xlu2 %169 }
 0x30a   :  { %654 = vrcp.f32 %v170_v35 }
 0x310   :  { %v655_v36 = vpop.eup %654 }
 0x311   :  { %v174_v17 = vmul.f32 %v655_v36, %v164_v9 }
 0x313   :  { %611 = vmatmul.msk.f32.gmra.mxu1 %vm149_vm9, %v174_v17 }
 0x353   :  { %v297_v32 = vpop.f32.mrf.mxu1 }
 0x355   :  { %v547_v43 = vpop.f32.mrf.mxu3 }
 0x359   :  { %v300_v37 = vpop.f32.mrf.mxu2 }
 0x35b   :  { %v578_v38 = vpop.f32.mrf.mxu1 }
 0x35c   :  { %v579_v39 = vadd.f32 %v578_v38, %v297_v32 }
 0x35d   :  { %v550_v50 = vpop.f32.mrf.mxu3 }
 0x361   :  { %v422_v41 = vpop.f32.mrf.mxu2 }
 0x362   :  { %v584_v42 = vadd.f32 %v579_v39, %v422_v41 }
 0x364   :  { %v586_v44 = vadd.f32 %v584_v42, %v547_v43 }
 0x366   :  { %v588_v45 = vmul.f32 0.25, %v586_v44 }
 0x368   :  { %590 = vst.msk [vmem:[%s957_s5] sm:$0xff] %vm99_vm1, %v588_v45 }
 0x38c   :  { %v425_v48 = vpop.f32.mrf.mxu2 }
 0x390   :  { %v581_v46 = vpop.f32.mrf.mxu1 }
 0x391   :  { %v582_v47 = vadd.f32 %v581_v46, %v300_v37 }
 0x393   :  { %v585_v49 = vadd.f32 %v582_v47, %v425_v48 }
 0x395   :  { %v587_v51 = vadd.f32 %v585_v49, %v550_v50 }
 0x397   :  { %v589_v52 = vmul.f32 0.25, %v587_v51 }
 0x399   :  { %591 = vst.msk [vmem:[%s957_s5 + $0x8] sm:$0xf] %vm103_vm2, %v589_v52 }
 0x39a   :  { %596 = vsyncpa [#allocation3], 1 }
 0x39b   :  { %597 = vsyncpa [#allocation5], 1 }

</bundles_post_ra>
